<compile_context>
chip_gen: v6e
topology: v6e:2x2x1
jax: 0.10.0
libtpu: 0.0.40
codegen_flags: <defaults>
</compile_context>

<pallas_src>
import functools
import math

import jax
import jax.numpy as jnp
from jax import lax
from jax.experimental import pallas as pl
from jax.experimental.pallas import tpu as pltpu


def _round_up(x, m):
    return (x + m - 1) // m * m


def _pad_gate_cols(w, h, hp):
    """Pad each of the 4 PyTorch gate blocks (i,f,g,o) along the last axis h->hp."""
    if hp == h:
        return w
    parts = jnp.split(w, 4, axis=-1)
    pad = [(0, 0)] * (w.ndim - 1) + [(0, hp - h)]
    return jnp.concatenate([jnp.pad(p, pad) for p in parts], axis=-1)


def _sigmoid(x):
    # One EUP push (tanh) instead of exp + reciprocal: sigmoid(x) == 0.5*tanh(0.5*x)+0.5.
    return 0.5 * jnp.tanh(0.5 * x) + 0.5


def _cell(gates, c_prev, hp, act):
    """One LSTM cell update from pre-activation gates (PyTorch gate order i,f,g,o)."""
    i = _sigmoid(gates[:, 0 * hp:1 * hp])
    f = _sigmoid(gates[:, 1 * hp:2 * hp])
    g = jnp.tanh(gates[:, 2 * hp:3 * hp])
    o = _sigmoid(gates[:, 3 * hp:4 * hp])
    c = f * c_prev + i * g
    h = o * jnp.tanh(c)
    # Post-LSTM nn.ReLU applies to the output stream only, never to the state.
    y = jnp.maximum(h, 0.0) if act == "relu" else h
    return h, c, y


# ---------------------------------------------------------------------------
# Kernel: one (batch-block, time-chunk) grid step.
#   x_ref   : (t_chunk, b_blk, D)   layer input chunk (time-major, padded)
#   wih_ref : (D, 4*Hp)             input weight (gate-aligned, padded)
#   whh_ref : (Hp, 4*Hp)            recurrent weight (gate-aligned, padded)
#   b_ref   : (1, 4*Hp)             combined bias (f32)
#   out_ref : (t_chunk, b_blk, Hp)  per-timestep hidden output
#   gx_scr  : VMEM (t_chunk, b_blk, 4*Hp) f32  fused input projection for the chunk
#   h_scr/c_scr : VMEM (b_blk, Hp) f32         state carried across time chunks
# Padded hidden lanes stay exactly zero (zero weight cols + zero bias).
# ---------------------------------------------------------------------------
def _lstm_chunk_kernel(x_ref, wih_ref, whh_ref, b_ref, out_ref,
                       gx_scr, h_scr, c_scr,
                       *, t_chunk, hp, b_blk, n_sub, act, unroll):
    # Re-init recurrent state at the start of each batch block's time sweep.
    @pl.when(pl.program_id(1) == 0)
    def _():
        h_scr[...] = jnp.zeros_like(h_scr)
        c_scr[...] = jnp.zeros_like(c_scr)

    d_in = x_ref.shape[-1]

    # Fused input projection for the whole chunk: one lane-dense MXU matmul,
    # result kept in VMEM scratch (no HBM gx round-trip).
    w_ih = wih_ref[...]
    x2d = x_ref[...].reshape(t_chunk * b_blk, d_in)   # free: b_blk % 8 == 0
    gx2d = jnp.dot(x2d.astype(w_ih.dtype), w_ih,
                   preferred_element_type=jnp.float32) + b_ref[...]
    gx_scr[...] = gx2d.reshape(t_chunk, b_blk, 4 * hp)

    w_hh = whh_ref[...]
    bs = b_blk // n_sub          # sub-block rows (multiple of 8)

    def step(t, carry):
        hs, cs = carry
        new_h, new_c = [], []
        # n_sub independent batch sub-blocks give the scheduler independent
        # dependency chains: the recurrent matmul of one overlaps the EUP/VPU
        # gate math of the other.
        for s in range(n_sub):
            lo, hi = s * bs, (s + 1) * bs
            gates = gx_scr[t, lo:hi] + jnp.dot(
                hs[s].astype(w_hh.dtype), w_hh,
                preferred_element_type=jnp.float32)
            h, c, y = _cell(gates, cs[s], hp, act)
            out_ref[t, lo:hi] = y.astype(out_ref.dtype)
            new_h.append(h)
            new_c.append(c)
        return tuple(new_h), tuple(new_c)

    h0 = tuple(h_scr[s * bs:(s + 1) * bs] for s in range(n_sub))
    c0 = tuple(c_scr[s * bs:(s + 1) * bs] for s in range(n_sub))
    hs, cs = lax.fori_loop(0, t_chunk, step, (h0, c0), unroll=unroll)
    for s in range(n_sub):
        h_scr[s * bs:(s + 1) * bs] = hs[s]
        c_scr[s * bs:(s + 1) * bs] = cs[s]


def _lstm_layer(xin, w_ih_p, w_hh_p, b_p, *, t_chunk, b_blk, act, out_dtype,
                vmem_limit):
    """One LSTM layer over a padded, time-major input [Tp, Bp, D] -> [Tp, Bp, Hp]."""
    tp, bp, d_in = xin.shape
    hp = w_hh_p.shape[0]
    nt = tp // t_chunk
    nb = bp // b_blk
    n_sub = 2 if (b_blk >= 16 and b_blk % 16 == 0) else 1

    # Tile-size-aware unroll: full unroll only for tiny chunks; large gate tiles
    # mostly bloat code / raise spill pressure.
    gate_vregs = pl.cdiv(b_blk * 4 * hp, 8 * 128)
    if t_chunk <= 8:
        unroll = True
    elif gate_vregs <= 32:
        unroll = 4
    else:
        unroll = 2

    kernel = functools.partial(_lstm_chunk_kernel, t_chunk=t_chunk, hp=hp,
                               b_blk=b_blk, n_sub=n_sub, act=act, unroll=unroll)
    bias2d = b_p.reshape(1, 4 * hp).astype(jnp.float32)

    # TODO(synk): mark the grid-invariant weight specs pipeline_mode=pl.Buffered(1)
    # once single-buffered inputs are confirmed on the target jax build; the
    # constant index_map already avoids refetching, only the 2nd buffer is wasted.
    return pl.pallas_call(
        kernel,
        out_shape=jax.ShapeDtypeStruct((tp, bp, hp), out_dtype),
        grid_spec=pltpu.PrefetchScalarGridSpec(
            num_scalar_prefetch=0,
            grid=(nb, nt),
            in_specs=[
                pl.BlockSpec((t_chunk, b_blk, d_in), lambda ib, it: (it, ib, 0)),
                pl.BlockSpec((d_in, 4 * hp), lambda ib, it: (0, 0)),   # invariant
                pl.BlockSpec((hp, 4 * hp), lambda ib, it: (0, 0)),     # invariant
                pl.BlockSpec((1, 4 * hp), lambda ib, it: (0, 0)),      # invariant
            ],
            out_specs=pl.BlockSpec((t_chunk, b_blk, hp),
                                   lambda ib, it: (it, ib, 0)),
            scratch_shapes=[
                pltpu.VMEM((t_chunk, b_blk, 4 * hp), jnp.float32),   # fused gx chunk
                pltpu.VMEM((b_blk, hp), jnp.float32),                # h state
                pltpu.VMEM((b_blk, hp), jnp.float32),                # c state
            ],
        ),
        compiler_params=pltpu.CompilerParams(
            # batch blocks are independent (megacore-shardable); time is serial.
            dimension_semantics=("parallel", "arbitrary"),
            vmem_limit_bytes=vmem_limit),
    )(xin, w_ih_p, w_hh_p, bias2d)


# ---------------------------------------------------------------------------
# EncoderRNN forward: stacked LSTM (batch_first) -> ReLU.
# ---------------------------------------------------------------------------
def encoder_rnn_forward(x, params, *, mxu_dtype=jnp.float32, t_chunk=None,
                        b_blk=None, vmem_budget_bytes=28 * 1024 * 1024):
    """x: [B, T, input_size] -> [B, T, hidden_size] (f32).

    params: list of (w_ih [D_in,4H], w_hh [H,4H], b [4H]) per layer,
    gate order i,f,g,o, b = b_ih + b_hh (combined).
    """
    B, T, D = x.shape
    n_layers = len(params)
    H = params[0][1].shape[0]

    # TODO(synk): per-gate padding H -> multiple of 128 keeps gate slices lane-aligned
    # and the output lane-dense at the cost of inflated MXU/VPU work for tiny H;
    # accepted per review (irrelevant once H >= 128).
    Hp = _round_up(H, 128)
    Dp = _round_up(D, 8)
    Bp8 = _round_up(B, 8)

    if b_blk is None:
        # >=2 batch blocks whenever B allows it (v7x megacore); capped at 128 rows.
        b_blk = 8 if Bp8 < 16 else min(128, _round_up(Bp8 // 2, 8))
    Bp = _round_up(Bp8, b_blk)

    mxu_bytes = jnp.dtype(mxu_dtype).itemsize
    d_max = max(Dp, Hp) if n_layers > 1 else Dp

    # Explicit VMEM budget: x & out double-buffered, gx/h/c scratch single-buffered,
    # weights conservatively counted double-buffered.
    fixed = (2 * (d_max + Hp) * 4 * Hp * mxu_bytes    # W_ih + W_hh
             + 2 * b_blk * Hp * 4                     # h/c scratch
             + 2 * 4 * Hp * 4)                        # bias
    per_t = b_blk * (2 * d_max * mxu_bytes            # x chunk (double-buffered)
                     + 2 * Hp * 4                     # out chunk (f32 worst case)
                     + 4 * Hp * 4)                    # gx scratch
    if t_chunk is None:
        avail = max(per_t, vmem_budget_bytes - fixed)
        t_chunk = int(min(T, max(1, avail // per_t), 256))
    Tp = _round_up(T, t_chunk)

    est = fixed + per_t * t_chunk
    vmem_limit = int(min(max(32 * 1024 * 1024, est * 3 // 2), 112 * 1024 * 1024))

    # Time-major padded input for layer 0 (single boundary transpose).
    cur = jnp.transpose(x, (1, 0, 2)).astype(mxu_dtype)
    cur = jnp.pad(cur, ((0, Tp - T), (0, Bp - B), (0, Dp - D)))

    for li, (w_ih, w_hh, b) in enumerate(params):
        d_in = w_ih.shape[0]
        d_in_p = Dp if li == 0 else Hp
        w_ih_p = _pad_gate_cols(w_ih, H, Hp)                        # [d_in, 4Hp]
        w_ih_p = jnp.pad(w_ih_p, ((0, d_in_p - d_in), (0, 0)))      # rows -> padded
        w_hh_p = _pad_gate_cols(w_hh, H, Hp)
        w_hh_p = jnp.pad(w_hh_p, ((0, Hp - H), (0, 0)))             # [Hp, 4Hp]
        b_p = _pad_gate_cols(b, H, Hp)                              # [4Hp]

        last = li == n_layers - 1
        cur = _lstm_layer(cur,
                          w_ih_p.astype(mxu_dtype),
                          w_hh_p.astype(mxu_dtype),
                          b_p,
                          t_chunk=t_chunk, b_blk=b_blk,
                          act="relu" if last else "none",
                          out_dtype=jnp.float32 if last else mxu_dtype,
                          vmem_limit=vmem_limit)

    # Strip padding, back to batch-first.
    return jnp.transpose(cur[:T, :B, :H], (1, 0, 2)).astype(jnp.float32)


# ---------------------------------------------------------------------------
# Parameter init mirroring EncoderRNN.__init__:
#   xavier_uniform(gain=sqrt(2)) for W_ih / W_hh, PyTorch-default uniform biases.
# Weights stored transposed ([fan_in, 4H]) so the kernel does x @ W directly.
# ---------------------------------------------------------------------------
def _xavier_uniform(key, fan_in, fan_out, gain):
    bound = gain * math.sqrt(6.0 / (fan_in + fan_out))
    return jax.random.uniform(key, (fan_in, fan_out), jnp.float32, -bound, bound)


def make_encoder_params(key, input_size, hidden_size, num_layers):
    gain = math.sqrt(2.0)
    params = []
    for layer in range(num_layers):
        d_in = input_size if layer == 0 else hidden_size
        key, k1, k2, k3, k4 = jax.random.split(key, 5)
        w_ih = _xavier_uniform(k1, d_in, 4 * hidden_size, gain)          # [D_in,4H]
        w_hh = _xavier_uniform(k2, hidden_size, 4 * hidden_size, gain)   # [H,4H]
        bound = 1.0 / math.sqrt(hidden_size)
        b_ih = jax.random.uniform(k3, (4 * hidden_size,), jnp.float32, -bound, bound)
        b_hh = jax.random.uniform(k4, (4 * hidden_size,), jnp.float32, -bound, bound)
        params.append((w_ih, w_hh, b_ih + b_hh))
    return params, key


# ---------------------------------------------------------------------------
# Pure-JAX reference (lax.scan) for correctness.
# ---------------------------------------------------------------------------
def encoder_rnn_forward_ref(x, params):
    B = x.shape[0]
    y = jnp.transpose(x, (1, 0, 2))          # time-major
    for (w_ih, w_hh, b) in params:
        H = w_hh.shape[0]

        def step(carry, x_t, w_ih=w_ih, w_hh=w_hh, b=b, H=H):
            h, c = carry
            gates = x_t @ w_ih + h @ w_hh + b
            i = jax.nn.sigmoid(gates[:, 0 * H:1 * H])
            f = jax.nn.sigmoid(gates[:, 1 * H:2 * H])
            g = jnp.tanh(gates[:, 2 * H:3 * H])
            o = jax.nn.sigmoid(gates[:, 3 * H:4 * H])
            c = f * c + i * g
            h = o * jnp.tanh(c)
            return (h, c), h

        init = (jnp.zeros((B, H), jnp.float32), jnp.zeros((B, H), jnp.float32))
        _, y = lax.scan(step, init, y)
    y = jnp.maximum(y, 0.0)                   # nn.ReLU on the LSTM output stream
    return jnp.transpose(y, (1, 0, 2))


if __name__ == "__main__":
    # Case 1: shapes consistent with the module: batch=2, seq=8, input=16, hidden=32.
    B, T = 2, 8
    input_size, hidden_size, num_layers = 16, 32, 1

    key = jax.random.PRNGKey(0)
    key, kx = jax.random.split(key)
    x = jax.random.normal(kx, (B, T, input_size), jnp.float32)
    params, key = make_encoder_params(key, input_size, hidden_size, num_layers)

    out = jax.block_until_ready(
        jax.jit(lambda xx: encoder_rnn_forward(xx, params))(x))
    ref = jax.block_until_ready(encoder_rnn_forward_ref(x, params))
    assert out.shape == (B, T, hidden_size), out.shape
    err = float(jnp.max(jnp.abs(out - ref)))
    assert err < 1e-4, err

    # bf16 MXU-operand / storage path (v6e/v7x): f32 accumulation, f32 gate math.
    out_bf16 = jax.block_until_ready(
        jax.jit(lambda xx: encoder_rnn_forward(xx, params,
                                               mxu_dtype=jnp.bfloat16))(x))
    err_bf16 = float(jnp.max(jnp.abs(out_bf16 - ref)))
    assert err_bf16 < 5e-2, err_bf16

    # Case 2: exercises 2 batch blocks (megacore path), the 2-sub-block MXU/EUP
    # interleave, multiple time chunks with carried state, gate/row/time padding
    # and a stacked (2-layer) LSTM.
    B2, T2, D2, H2, L2 = 32, 20, 24, 48, 2
    key, kx2 = jax.random.split(key)
    x2 = jax.random.normal(kx2, (B2, T2, D2), jnp.float32)
    params2, key = make_encoder_params(key, D2, H2, L2)
    out2 = jax.block_until_ready(
        jax.jit(lambda xx: encoder_rnn_forward(xx, params2, t_chunk=8))(x2))
    ref2 = jax.block_until_ready(encoder_rnn_forward_ref(x2, params2))
    assert out2.shape == (B2, T2, H2), out2.shape
    err2 = float(jnp.max(jnp.abs(out2 - ref2)))
    assert err2 < 2e-4, err2

    print("KERNEL_OK")
</pallas_src>

<mosaic_0001>
module attributes {stable_mosaic.version = 11 : i64} {
  func.func @_lstm_chunk_kernel(%arg0: i32, %arg1: i32, %arg2: memref<8x8x16xf32, #tpu.memory_space<vmem>>, %arg3: memref<16x512xf32, #tpu.memory_space<vmem>>, %arg4: memref<128x512xf32, #tpu.memory_space<vmem>>, %arg5: memref<1x512xf32, #tpu.memory_space<vmem>>, %arg6: memref<8x8x128xf32, #tpu.memory_space<vmem>>, %arg7: memref<8x8x512xf32, #tpu.memory_space<vmem>>, %arg8: memref<8x128xf32, #tpu.memory_space<vmem>>, %arg9: memref<8x128xf32, #tpu.memory_space<vmem>>) attributes {dimension_semantics = [#tpu.dimension_semantics<parallel>, #tpu.dimension_semantics<arbitrary>], iteration_bounds = array<i64: 1, 1>, scalar_prefetch = 0 : i64, scratch_operands = 3 : i64, tpu.core_type = #tpu.core_type<tc>, window_params = [{transform_indices = @transform_0, window_bounds = array<i64: 8, 8, 16>}, {pipeline_mode = #tpu.pipeline_mode<synchronous>, transform_indices = @transform_1, window_bounds = array<i64: 16, 512>}, {pipeline_mode = #tpu.pipeline_mode<synchronous>, transform_indices = @transform_2, window_bounds = array<i64: 128, 512>}, {pipeline_mode = #tpu.pipeline_mode<synchronous>, transform_indices = @transform_3, window_bounds = array<i64: 1, 512>}, {transform_indices = @transform_4, window_bounds = array<i64: 8, 8, 128>}]} {
    %c0_i32 = arith.constant 0 : i32
    %0 = arith.cmpi eq, %arg1, %c0_i32 : i32
    %1 = arith.extui %0 : i1 to i32
    %c0_i32_0 = arith.constant 0 : i32
    %2 = arith.cmpi ne, %1, %c0_i32_0 : i32
    scf.if %2 {
      %cst_141 = arith.constant 0.000000e+00 : f32
      %353 = vector.broadcast %cst_141 : f32 to vector<8x128xf32>
      %c0_142 = arith.constant 0 : index
      %c0_143 = arith.constant 0 : index
      %354 = vector.load %arg8[%c0_142, %c0_143] : memref<8x128xf32, #tpu.memory_space<vmem>>, vector<8x128xf32>
      tpu.vector_store %arg8[%c0_142, %c0_143], %353 {strides = array<i32>} : memref<8x128xf32, #tpu.memory_space<vmem>>, vector<8x128xf32>,
      %cst_144 = arith.constant 0.000000e+00 : f32
      %355 = vector.broadcast %cst_144 : f32 to vector<8x128xf32>
      %c0_145 = arith.constant 0 : index
      %c0_146 = arith.constant 0 : index
      %356 = vector.load %arg9[%c0_145, %c0_146] : memref<8x128xf32, #tpu.memory_space<vmem>>, vector<8x128xf32>
      tpu.vector_store %arg9[%c0_145, %c0_146], %355 {strides = array<i32>} : memref<8x128xf32, #tpu.memory_space<vmem>>, vector<8x128xf32>,
    } else {
    }
    %c0 = arith.constant 0 : index
    %c0_1 = arith.constant 0 : index
    %3 = vector.load %arg3[%c0, %c0_1] : memref<16x512xf32, #tpu.memory_space<vmem>>, vector<16x512xf32>
    %c0_2 = arith.constant 0 : index
    %c0_3 = arith.constant 0 : index
    %c0_4 = arith.constant 0 : index
    %4 = vector.load %arg2[%c0_2, %c0_3, %c0_4] : memref<8x8x16xf32, #tpu.memory_space<vmem>>, vector<8x8x16xf32>
    %5 = vector.shape_cast %4 : vector<8x8x16xf32> to vector<64x16xf32>
    %cst = arith.constant dense<0.000000e+00> : vector<64x512xf32>
    %6 = tpu.matmul %5, %3, %cst {dimension_numbers = #tpu.dot_dimension_numbers<[1], [0], [0], [1], [0, 0, 1, 1], [], []>} : vector<64x16xf32>, vector<16x512xf32>, vector<64x512xf32> -> vector<64x512xf32>
    %c0_5 = arith.constant 0 : index
    %c0_6 = arith.constant 0 : index
    %7 = vector.load %arg5[%c0_5, %c0_6] : memref<1x512xf32, #tpu.memory_space<vmem>>, vector<1x512xf32>
    %8 = vector.broadcast %7 : vector<1x512xf32> to vector<64x512xf32>
    %9 = arith.addf %6, %8 : vector<64x512xf32>
    %10 = vector.shape_cast %9 : vector<64x512xf32> to vector<8x8x512xf32>
    %c0_7 = arith.constant 0 : index
    %c0_8 = arith.constant 0 : index
    %c0_9 = arith.constant 0 : index
    %11 = vector.load %arg7[%c0_7, %c0_8, %c0_9] : memref<8x8x512xf32, #tpu.memory_space<vmem>>, vector<8x8x512xf32>
    tpu.vector_store %arg7[%c0_7, %c0_8, %c0_9], %10 {strides = array<i32>} : memref<8x8x512xf32, #tpu.memory_space<vmem>>, vector<8x8x512xf32>,
    %c0_10 = arith.constant 0 : index
    %c0_11 = arith.constant 0 : index
    %12 = vector.load %arg4[%c0_10, %c0_11] : memref<128x512xf32, #tpu.memory_space<vmem>>, vector<128x512xf32>
    %c0_12 = arith.constant 0 : index
    %c0_13 = arith.constant 0 : index
    %13 = vector.load %arg8[%c0_12, %c0_13] : memref<8x128xf32, #tpu.memory_space<vmem>>, vector<8x128xf32>
    %c0_14 = arith.constant 0 : index
    %c0_15 = arith.constant 0 : index
    %14 = vector.load %arg9[%c0_14, %c0_15] : memref<8x128xf32, #tpu.memory_space<vmem>>, vector<8x128xf32>
    %c0_i32_16 = arith.constant 0 : i32
    %15 = arith.index_cast %c0_i32_16 : i32 to index
    %c0_17 = arith.constant 0 : index
    %c0_18 = arith.constant 0 : index
    %16 = vector.load %arg7[%15, %c0_17, %c0_18] : memref<8x8x512xf32, #tpu.memory_space<vmem>>, vector<1x8x512xf32>
    %17 = vector.shape_cast %16 : vector<1x8x512xf32> to vector<8x512xf32>
    %cst_19 = arith.constant dense<0.000000e+00> : vector<8x512xf32>
    %18 = tpu.matmul %13, %12, %cst_19 {dimension_numbers = #tpu.dot_dimension_numbers<[1], [0], [0], [1], [0, 0, 1, 1], [], []>} : vector<8x128xf32>, vector<128x512xf32>, vector<8x512xf32> -> vector<8x512xf32>
    %19 = arith.addf %17, %18 : vector<8x512xf32>
    %20 = vector.extract_strided_slice %19 {offsets = [0, 0], sizes = [8, 128], strides = [1, 1]} : vector<8x512xf32> to vector<8x128xf32>
    %cst_20 = arith.constant 5.000000e-01 : f32
    %21 = vector.broadcast %cst_20 : f32 to vector<8x128xf32>
    %22 = arith.mulf %21, %20 : vector<8x128xf32>
    %23 = math.tanh %22 : vector<8x128xf32>
    %cst_21 = arith.constant 5.000000e-01 : f32
    %24 = vector.broadcast %cst_21 : f32 to vector<8x128xf32>
    %25 = arith.mulf %24, %23 : vector<8x128xf32>
    %cst_22 = arith.constant 5.000000e-01 : f32
    %26 = vector.broadcast %cst_22 : f32 to vector<8x128xf32>
    %27 = arith.addf %25, %26 : vector<8x128xf32>
    %28 = vector.extract_strided_slice %19 {offsets = [0, 128], sizes = [8, 128], strides = [1, 1]} : vector<8x512xf32> to vector<8x128xf32>
    %cst_23 = arith.constant 5.000000e-01 : f32
    %29 = vector.broadcast %cst_23 : f32 to vector<8x128xf32>
    %30 = arith.mulf %29, %28 : vector<8x128xf32>
    %31 = math.tanh %30 : vector<8x128xf32>
    %cst_24 = arith.constant 5.000000e-01 : f32
    %32 = vector.broadcast %cst_24 : f32 to vector<8x128xf32>
    %33 = arith.mulf %32, %31 : vector<8x128xf32>
    %cst_25 = arith.constant 5.000000e-01 : f32
    %34 = vector.broadcast %cst_25 : f32 to vector<8x128xf32>
    %35 = arith.addf %33, %34 : vector<8x128xf32>
    %36 = vector.extract_strided_slice %19 {offsets = [0, 256], sizes = [8, 128], strides = [1, 1]} : vector<8x512xf32> to vector<8x128xf32>
    %37 = math.tanh %36 : vector<8x128xf32>
    %38 = vector.extract_strided_slice %19 {offsets = [0, 384], sizes = [8, 128], strides = [1, 1]} : vector<8x512xf32> to vector<8x128xf32>
    %cst_26 = arith.constant 5.000000e-01 : f32
    %39 = vector.broadcast %cst_26 : f32 to vector<8x128xf32>
    %40 = arith.mulf %39, %38 : vector<8x128xf32>
    %41 = math.tanh %40 : vector<8x128xf32>
    %cst_27 = arith.constant 5.000000e-01 : f32
    %42 = vector.broadcast %cst_27 : f32 to vector<8x128xf32>
    %43 = arith.mulf %42, %41 : vector<8x128xf32>
    %cst_28 = arith.constant 5.000000e-01 : f32
    %44 = vector.broadcast %cst_28 : f32 to vector<8x128xf32>
    %45 = arith.addf %43, %44 : vector<8x128xf32>
    %46 = arith.mulf %35, %14 : vector<8x128xf32>
    %47 = arith.mulf %27, %37 : vector<8x128xf32>
    %48 = arith.addf %46, %47 : vector<8x128xf32>
    %49 = math.tanh %48 : vector<8x128xf32>
    %50 = arith.mulf %45, %49 : vector<8x128xf32>
    %cst_29 = arith.constant 0.000000e+00 : f32
    %51 = vector.broadcast %cst_29 : f32 to vector<8x128xf32>
    %52 = arith.maximumf %50, %51 : vector<8x128xf32>
    %53 = arith.index_cast %c0_i32_16 : i32 to index
    %c0_30 = arith.constant 0 : index
    %c0_31 = arith.constant 0 : index
    %54 = vector.load %arg6[%53, %c0_30, %c0_31] : memref<8x8x128xf32, #tpu.memory_space<vmem>>, vector<1x8x128xf32>
    %55 = vector.shape_cast %54 : vector<1x8x128xf32> to vector<8x128xf32>
    %56 = vector.shape_cast %52 : vector<8x128xf32> to vector<1x8x128xf32>
    tpu.vector_store %arg6[%53, %c0_30, %c0_31], %56 {strides = array<i32>} : memref<8x8x128xf32, #tpu.memory_space<vmem>>, vector<1x8x128xf32>,
    %c1_i32 = arith.constant 1 : i32
    %57 = arith.index_cast %c1_i32 : i32 to index
    %c0_32 = arith.constant 0 : index
    %c0_33 = arith.constant 0 : index
    %58 = vector.load %arg7[%57, %c0_32, %c0_33] : memref<8x8x512xf32, #tpu.memory_space<vmem>>, vector<1x8x512xf32>
    %59 = vector.shape_cast %58 : vector<1x8x512xf32> to vector<8x512xf32>
    %cst_34 = arith.constant dense<0.000000e+00> : vector<8x512xf32>
    %60 = tpu.matmul %50, %12, %cst_34 {dimension_numbers = #tpu.dot_dimension_numbers<[1], [0], [0], [1], [0, 0, 1, 1], [], []>} : vector<8x128xf32>, vector<128x512xf32>, vector<8x512xf32> -> vector<8x512xf32>
    %61 = arith.addf %59, %60 : vector<8x512xf32>
    %62 = vector.extract_strided_slice %61 {offsets = [0, 0], sizes = [8, 128], strides = [1, 1]} : vector<8x512xf32> to vector<8x128xf32>
    %cst_35 = arith.constant 5.000000e-01 : f32
    %63 = vector.broadcast %cst_35 : f32 to vector<8x128xf32>
    %64 = arith.mulf %63, %62 : vector<8x128xf32>
    %65 = math.tanh %64 : vector<8x128xf32>
    %cst_36 = arith.constant 5.000000e-01 : f32
    %66 = vector.broadcast %cst_36 : f32 to vector<8x128xf32>
    %67 = arith.mulf %66, %65 : vector<8x128xf32>
    %cst_37 = arith.constant 5.000000e-01 : f32
    %68 = vector.broadcast %cst_37 : f32 to vector<8x128xf32>
    %69 = arith.addf %67, %68 : vector<8x128xf32>
    %70 = vector.extract_strided_slice %61 {offsets = [0, 128], sizes = [8, 128], strides = [1, 1]} : vector<8x512xf32> to vector<8x128xf32>
    %cst_38 = arith.constant 5.000000e-01 : f32
    %71 = vector.broadcast %cst_38 : f32 to vector<8x128xf32>
    %72 = arith.mulf %71, %70 : vector<8x128xf32>
    %73 = math.tanh %72 : vector<8x128xf32>
    %cst_39 = arith.constant 5.000000e-01 : f32
    %74 = vector.broadcast %cst_39 : f32 to vector<8x128xf32>
    %75 = arith.mulf %74, %73 : vector<8x128xf32>
    %cst_40 = arith.constant 5.000000e-01 : f32
    %76 = vector.broadcast %cst_40 : f32 to vector<8x128xf32>
    %77 = arith.addf %75, %76 : vector<8x128xf32>
    %78 = vector.extract_strided_slice %61 {offsets = [0, 256], sizes = [8, 128], strides = [1, 1]} : vector<8x512xf32> to vector<8x128xf32>
    %79 = math.tanh %78 : vector<8x128xf32>
    %80 = vector.extract_strided_slice %61 {offsets = [0, 384], sizes = [8, 128], strides = [1, 1]} : vector<8x512xf32> to vector<8x128xf32>
    %cst_41 = arith.constant 5.000000e-01 : f32
    %81 = vector.broadcast %cst_41 : f32 to vector<8x128xf32>
    %82 = arith.mulf %81, %80 : vector<8x128xf32>
    %83 = math.tanh %82 : vector<8x128xf32>
    %cst_42 = arith.constant 5.000000e-01 : f32
    %84 = vector.broadcast %cst_42 : f32 to vector<8x128xf32>
    %85 = arith.mulf %84, %83 : vector<8x128xf32>
    %cst_43 = arith.constant 5.000000e-01 : f32
    %86 = vector.broadcast %cst_43 : f32 to vector<8x128xf32>
    %87 = arith.addf %85, %86 : vector<8x128xf32>
    %88 = arith.mulf %77, %48 : vector<8x128xf32>
    %89 = arith.mulf %69, %79 : vector<8x128xf32>
    %90 = arith.addf %88, %89 : vector<8x128xf32>
    %91 = math.tanh %90 : vector<8x128xf32>
    %92 = arith.mulf %87, %91 : vector<8x128xf32>
    %cst_44 = arith.constant 0.000000e+00 : f32
    %93 = vector.broadcast %cst_44 : f32 to vector<8x128xf32>
    %94 = arith.maximumf %92, %93 : vector<8x128xf32>
    %95 = arith.index_cast %c1_i32 : i32 to index
    %c0_45 = arith.constant 0 : index
    %c0_46 = arith.constant 0 : index
    %96 = vector.load %arg6[%95, %c0_45, %c0_46] : memref<8x8x128xf32, #tpu.memory_space<vmem>>, vector<1x8x128xf32>
    %97 = vector.shape_cast %96 : vector<1x8x128xf32> to vector<8x128xf32>
    %98 = vector.shape_cast %94 : vector<8x128xf32> to vector<1x8x128xf32>
    tpu.vector_store %arg6[%95, %c0_45, %c0_46], %98 {strides = array<i32>} : memref<8x8x128xf32, #tpu.memory_space<vmem>>, vector<1x8x128xf32>,
    %c2_i32 = arith.constant 2 : i32
    %99 = arith.index_cast %c2_i32 : i32 to index
    %c0_47 = arith.constant 0 : index
    %c0_48 = arith.constant 0 : index
    %100 = vector.load %arg7[%99, %c0_47, %c0_48] : memref<8x8x512xf32, #tpu.memory_space<vmem>>, vector<1x8x512xf32>
    %101 = vector.shape_cast %100 : vector<1x8x512xf32> to vector<8x512xf32>
    %cst_49 = arith.constant dense<0.000000e+00> : vector<8x512xf32>
    %102 = tpu.matmul %92, %12, %cst_49 {dimension_numbers = #tpu.dot_dimension_numbers<[1], [0], [0], [1], [0, 0, 1, 1], [], []>} : vector<8x128xf32>, vector<128x512xf32>, vector<8x512xf32> -> vector<8x512xf32>
    %103 = arith.addf %101, %102 : vector<8x512xf32>
    %104 = vector.extract_strided_slice %103 {offsets = [0, 0], sizes = [8, 128], strides = [1, 1]} : vector<8x512xf32> to vector<8x128xf32>
    %cst_50 = arith.constant 5.000000e-01 : f32
    %105 = vector.broadcast %cst_50 : f32 to vector<8x128xf32>
    %106 = arith.mulf %105, %104 : vector<8x128xf32>
    %107 = math.tanh %106 : vector<8x128xf32>
    %cst_51 = arith.constant 5.000000e-01 : f32
    %108 = vector.broadcast %cst_51 : f32 to vector<8x128xf32>
    %109 = arith.mulf %108, %107 : vector<8x128xf32>
    %cst_52 = arith.constant 5.000000e-01 : f32
    %110 = vector.broadcast %cst_52 : f32 to vector<8x128xf32>
    %111 = arith.addf %109, %110 : vector<8x128xf32>
    %112 = vector.extract_strided_slice %103 {offsets = [0, 128], sizes = [8, 128], strides = [1, 1]} : vector<8x512xf32> to vector<8x128xf32>
    %cst_53 = arith.constant 5.000000e-01 : f32
    %113 = vector.broadcast %cst_53 : f32 to vector<8x128xf32>
    %114 = arith.mulf %113, %112 : vector<8x128xf32>
    %115 = math.tanh %114 : vector<8x128xf32>
    %cst_54 = arith.constant 5.000000e-01 : f32
    %116 = vector.broadcast %cst_54 : f32 to vector<8x128xf32>
    %117 = arith.mulf %116, %115 : vector<8x128xf32>
    %cst_55 = arith.constant 5.000000e-01 : f32
    %118 = vector.broadcast %cst_55 : f32 to vector<8x128xf32>
    %119 = arith.addf %117, %118 : vector<8x128xf32>
    %120 = vector.extract_strided_slice %103 {offsets = [0, 256], sizes = [8, 128], strides = [1, 1]} : vector<8x512xf32> to vector<8x128xf32>
    %121 = math.tanh %120 : vector<8x128xf32>
    %122 = vector.extract_strided_slice %103 {offsets = [0, 384], sizes = [8, 128], strides = [1, 1]} : vector<8x512xf32> to vector<8x128xf32>
    %cst_56 = arith.constant 5.000000e-01 : f32
    %123 = vector.broadcast %cst_56 : f32 to vector<8x128xf32>
    %124 = arith.mulf %123, %122 : vector<8x128xf32>
    %125 = math.tanh %124 : vector<8x128xf32>
    %cst_57 = arith.constant 5.000000e-01 : f32
    %126 = vector.broadcast %cst_57 : f32 to vector<8x128xf32>
    %127 = arith.mulf %126, %125 : vector<8x128xf32>
    %cst_58 = arith.constant 5.000000e-01 : f32
    %128 = vector.broadcast %cst_58 : f32 to vector<8x128xf32>
    %129 = arith.addf %127, %128 : vector<8x128xf32>
    %130 = arith.mulf %119, %90 : vector<8x128xf32>
    %131 = arith.mulf %111, %121 : vector<8x128xf32>
    %132 = arith.addf %130, %131 : vector<8x128xf32>
    %133 = math.tanh %132 : vector<8x128xf32>
    %134 = arith.mulf %129, %133 : vector<8x128xf32>
    %cst_59 = arith.constant 0.000000e+00 : f32
    %135 = vector.broadcast %cst_59 : f32 to vector<8x128xf32>
    %136 = arith.maximumf %134, %135 : vector<8x128xf32>
    %137 = arith.index_cast %c2_i32 : i32 to index
    %c0_60 = arith.constant 0 : index
    %c0_61 = arith.constant 0 : index
    %138 = vector.load %arg6[%137, %c0_60, %c0_61] : memref<8x8x128xf32, #tpu.memory_space<vmem>>, vector<1x8x128xf32>
    %139 = vector.shape_cast %138 : vector<1x8x128xf32> to vector<8x128xf32>
    %140 = vector.shape_cast %136 : vector<8x128xf32> to vector<1x8x128xf32>
    tpu.vector_store %arg6[%137, %c0_60, %c0_61], %140 {strides = array<i32>} : memref<8x8x128xf32, #tpu.memory_space<vmem>>, vector<1x8x128xf32>,
    %c3_i32 = arith.constant 3 : i32
    %141 = arith.index_cast %c3_i32 : i32 to index
    %c0_62 = arith.constant 0 : index
    %c0_63 = arith.constant 0 : index
    %142 = vector.load %arg7[%141, %c0_62, %c0_63] : memref<8x8x512xf32, #tpu.memory_space<vmem>>, vector<1x8x512xf32>
    %143 = vector.shape_cast %142 : vector<1x8x512xf32> to vector<8x512xf32>
    %cst_64 = arith.constant dense<0.000000e+00> : vector<8x512xf32>
    %144 = tpu.matmul %134, %12, %cst_64 {dimension_numbers = #tpu.dot_dimension_numbers<[1], [0], [0], [1], [0, 0, 1, 1], [], []>} : vector<8x128xf32>, vector<128x512xf32>, vector<8x512xf32> -> vector<8x512xf32>
    %145 = arith.addf %143, %144 : vector<8x512xf32>
    %146 = vector.extract_strided_slice %145 {offsets = [0, 0], sizes = [8, 128], strides = [1, 1]} : vector<8x512xf32> to vector<8x128xf32>
    %cst_65 = arith.constant 5.000000e-01 : f32
    %147 = vector.broadcast %cst_65 : f32 to vector<8x128xf32>
    %148 = arith.mulf %147, %146 : vector<8x128xf32>
    %149 = math.tanh %148 : vector<8x128xf32>
    %cst_66 = arith.constant 5.000000e-01 : f32
    %150 = vector.broadcast %cst_66 : f32 to vector<8x128xf32>
    %151 = arith.mulf %150, %149 : vector<8x128xf32>
    %cst_67 = arith.constant 5.000000e-01 : f32
    %152 = vector.broadcast %cst_67 : f32 to vector<8x128xf32>
    %153 = arith.addf %151, %152 : vector<8x128xf32>
    %154 = vector.extract_strided_slice %145 {offsets = [0, 128], sizes = [8, 128], strides = [1, 1]} : vector<8x512xf32> to vector<8x128xf32>
    %cst_68 = arith.constant 5.000000e-01 : f32
    %155 = vector.broadcast %cst_68 : f32 to vector<8x128xf32>
    %156 = arith.mulf %155, %154 : vector<8x128xf32>
    %157 = math.tanh %156 : vector<8x128xf32>
    %cst_69 = arith.constant 5.000000e-01 : f32
    %158 = vector.broadcast %cst_69 : f32 to vector<8x128xf32>
    %159 = arith.mulf %158, %157 : vector<8x128xf32>
    %cst_70 = arith.constant 5.000000e-01 : f32
    %160 = vector.broadcast %cst_70 : f32 to vector<8x128xf32>
    %161 = arith.addf %159, %160 : vector<8x128xf32>
    %162 = vector.extract_strided_slice %145 {offsets = [0, 256], sizes = [8, 128], strides = [1, 1]} : vector<8x512xf32> to vector<8x128xf32>
    %163 = math.tanh %162 : vector<8x128xf32>
    %164 = vector.extract_strided_slice %145 {offsets = [0, 384], sizes = [8, 128], strides = [1, 1]} : vector<8x512xf32> to vector<8x128xf32>
    %cst_71 = arith.constant 5.000000e-01 : f32
    %165 = vector.broadcast %cst_71 : f32 to vector<8x128xf32>
    %166 = arith.mulf %165, %164 : vector<8x128xf32>
    %167 = math.tanh %166 : vector<8x128xf32>
    %cst_72 = arith.constant 5.000000e-01 : f32
    %168 = vector.broadcast %cst_72 : f32 to vector<8x128xf32>
    %169 = arith.mulf %168, %167 : vector<8x128xf32>
    %cst_73 = arith.constant 5.000000e-01 : f32
    %170 = vector.broadcast %cst_73 : f32 to vector<8x128xf32>
    %171 = arith.addf %169, %170 : vector<8x128xf32>
    %172 = arith.mulf %161, %132 : vector<8x128xf32>
    %173 = arith.mulf %153, %163 : vector<8x128xf32>
    %174 = arith.addf %172, %173 : vector<8x128xf32>
    %175 = math.tanh %174 : vector<8x128xf32>
    %176 = arith.mulf %171, %175 : vector<8x128xf32>
    %cst_74 = arith.constant 0.000000e+00 : f32
    %177 = vector.broadcast %cst_74 : f32 to vector<8x128xf32>
    %178 = arith.maximumf %176, %177 : vector<8x128xf32>
    %179 = arith.index_cast %c3_i32 : i32 to index
    %c0_75 = arith.constant 0 : index
    %c0_76 = arith.constant 0 : index
    %180 = vector.load %arg6[%179, %c0_75, %c0_76] : memref<8x8x128xf32, #tpu.memory_space<vmem>>, vector<1x8x128xf32>
    %181 = vector.shape_cast %180 : vector<1x8x128xf32> to vector<8x128xf32>
    %182 = vector.shape_cast %178 : vector<8x128xf32> to vector<1x8x128xf32>
    tpu.vector_store %arg6[%179, %c0_75, %c0_76], %182 {strides = array<i32>} : memref<8x8x128xf32, #tpu.memory_space<vmem>>, vector<1x8x128xf32>,
    %c4_i32 = arith.constant 4 : i32
    %183 = arith.index_cast %c4_i32 : i32 to index
    %c0_77 = arith.constant 0 : index
    %c0_78 = arith.constant 0 : index
    %184 = vector.load %arg7[%183, %c0_77, %c0_78] : memref<8x8x512xf32, #tpu.memory_space<vmem>>, vector<1x8x512xf32>
    %185 = vector.shape_cast %184 : vector<1x8x512xf32> to vector<8x512xf32>
    %cst_79 = arith.constant dense<0.000000e+00> : vector<8x512xf32>
    %186 = tpu.matmul %176, %12, %cst_79 {dimension_numbers = #tpu.dot_dimension_numbers<[1], [0], [0], [1], [0, 0, 1, 1], [], []>} : vector<8x128xf32>, vector<128x512xf32>, vector<8x512xf32> -> vector<8x512xf32>
    %187 = arith.addf %185, %186 : vector<8x512xf32>
    %188 = vector.extract_strided_slice %187 {offsets = [0, 0], sizes = [8, 128], strides = [1, 1]} : vector<8x512xf32> to vector<8x128xf32>
    %cst_80 = arith.constant 5.000000e-01 : f32
    %189 = vector.broadcast %cst_80 : f32 to vector<8x128xf32>
    %190 = arith.mulf %189, %188 : vector<8x128xf32>
    %191 = math.tanh %190 : vector<8x128xf32>
    %cst_81 = arith.constant 5.000000e-01 : f32
    %192 = vector.broadcast %cst_81 : f32 to vector<8x128xf32>
    %193 = arith.mulf %192, %191 : vector<8x128xf32>
    %cst_82 = arith.constant 5.000000e-01 : f32
    %194 = vector.broadcast %cst_82 : f32 to vector<8x128xf32>
    %195 = arith.addf %193, %194 : vector<8x128xf32>
    %196 = vector.extract_strided_slice %187 {offsets = [0, 128], sizes = [8, 128], strides = [1, 1]} : vector<8x512xf32> to vector<8x128xf32>
    %cst_83 = arith.constant 5.000000e-01 : f32
    %197 = vector.broadcast %cst_83 : f32 to vector<8x128xf32>
    %198 = arith.mulf %197, %196 : vector<8x128xf32>
    %199 = math.tanh %198 : vector<8x128xf32>
    %cst_84 = arith.constant 5.000000e-01 : f32
    %200 = vector.broadcast %cst_84 : f32 to vector<8x128xf32>
    %201 = arith.mulf %200, %199 : vector<8x128xf32>
    %cst_85 = arith.constant 5.000000e-01 : f32
    %202 = vector.broadcast %cst_85 : f32 to vector<8x128xf32>
    %203 = arith.addf %201, %202 : vector<8x128xf32>
    %204 = vector.extract_strided_slice %187 {offsets = [0, 256], sizes = [8, 128], strides = [1, 1]} : vector<8x512xf32> to vector<8x128xf32>
    %205 = math.tanh %204 : vector<8x128xf32>
    %206 = vector.extract_strided_slice %187 {offsets = [0, 384], sizes = [8, 128], strides = [1, 1]} : vector<8x512xf32> to vector<8x128xf32>
    %cst_86 = arith.constant 5.000000e-01 : f32
    %207 = vector.broadcast %cst_86 : f32 to vector<8x128xf32>
    %208 = arith.mulf %207, %206 : vector<8x128xf32>
    %209 = math.tanh %208 : vector<8x128xf32>
    %cst_87 = arith.constant 5.000000e-01 : f32
    %210 = vector.broadcast %cst_87 : f32 to vector<8x128xf32>
    %211 = arith.mulf %210, %209 : vector<8x128xf32>
    %cst_88 = arith.constant 5.000000e-01 : f32
    %212 = vector.broadcast %cst_88 : f32 to vector<8x128xf32>
    %213 = arith.addf %211, %212 : vector<8x128xf32>
    %214 = arith.mulf %203, %174 : vector<8x128xf32>
    %215 = arith.mulf %195, %205 : vector<8x128xf32>
    %216 = arith.addf %214, %215 : vector<8x128xf32>
    %217 = math.tanh %216 : vector<8x128xf32>
    %218 = arith.mulf %213, %217 : vector<8x128xf32>
    %cst_89 = arith.constant 0.000000e+00 : f32
    %219 = vector.broadcast %cst_89 : f32 to vector<8x128xf32>
    %220 = arith.maximumf %218, %219 : vector<8x128xf32>
    %221 = arith.index_cast %c4_i32 : i32 to index
    %c0_90 = arith.constant 0 : index
    %c0_91 = arith.constant 0 : index
    %222 = vector.load %arg6[%221, %c0_90, %c0_91] : memref<8x8x128xf32, #tpu.memory_space<vmem>>, vector<1x8x128xf32>
    %223 = vector.shape_cast %222 : vector<1x8x128xf32> to vector<8x128xf32>
    %224 = vector.shape_cast %220 : vector<8x128xf32> to vector<1x8x128xf32>
    tpu.vector_store %arg6[%221, %c0_90, %c0_91], %224 {strides = array<i32>} : memref<8x8x128xf32, #tpu.memory_space<vmem>>, vector<1x8x128xf32>,
    %c5_i32 = arith.constant 5 : i32
    %225 = arith.index_cast %c5_i32 : i32 to index
    %c0_92 = arith.constant 0 : index
    %c0_93 = arith.constant 0 : index
    %226 = vector.load %arg7[%225, %c0_92, %c0_93] : memref<8x8x512xf32, #tpu.memory_space<vmem>>, vector<1x8x512xf32>
    %227 = vector.shape_cast %226 : vector<1x8x512xf32> to vector<8x512xf32>
    %cst_94 = arith.constant dense<0.000000e+00> : vector<8x512xf32>
    %228 = tpu.matmul %218, %12, %cst_94 {dimension_numbers = #tpu.dot_dimension_numbers<[1], [0], [0], [1], [0, 0, 1, 1], [], []>} : vector<8x128xf32>, vector<128x512xf32>, vector<8x512xf32> -> vector<8x512xf32>
    %229 = arith.addf %227, %228 : vector<8x512xf32>
    %230 = vector.extract_strided_slice %229 {offsets = [0, 0], sizes = [8, 128], strides = [1, 1]} : vector<8x512xf32> to vector<8x128xf32>
    %cst_95 = arith.constant 5.000000e-01 : f32
    %231 = vector.broadcast %cst_95 : f32 to vector<8x128xf32>
    %232 = arith.mulf %231, %230 : vector<8x128xf32>
    %233 = math.tanh %232 : vector<8x128xf32>
    %cst_96 = arith.constant 5.000000e-01 : f32
    %234 = vector.broadcast %cst_96 : f32 to vector<8x128xf32>
    %235 = arith.mulf %234, %233 : vector<8x128xf32>
    %cst_97 = arith.constant 5.000000e-01 : f32
    %236 = vector.broadcast %cst_97 : f32 to vector<8x128xf32>
    %237 = arith.addf %235, %236 : vector<8x128xf32>
    %238 = vector.extract_strided_slice %229 {offsets = [0, 128], sizes = [8, 128], strides = [1, 1]} : vector<8x512xf32> to vector<8x128xf32>
    %cst_98 = arith.constant 5.000000e-01 : f32
    %239 = vector.broadcast %cst_98 : f32 to vector<8x128xf32>
    %240 = arith.mulf %239, %238 : vector<8x128xf32>
    %241 = math.tanh %240 : vector<8x128xf32>
    %cst_99 = arith.constant 5.000000e-01 : f32
    %242 = vector.broadcast %cst_99 : f32 to vector<8x128xf32>
    %243 = arith.mulf %242, %241 : vector<8x128xf32>
    %cst_100 = arith.constant 5.000000e-01 : f32
    %244 = vector.broadcast %cst_100 : f32 to vector<8x128xf32>
    %245 = arith.addf %243, %244 : vector<8x128xf32>
    %246 = vector.extract_strided_slice %229 {offsets = [0, 256], sizes = [8, 128], strides = [1, 1]} : vector<8x512xf32> to vector<8x128xf32>
    %247 = math.tanh %246 : vector<8x128xf32>
    %248 = vector.extract_strided_slice %229 {offsets = [0, 384], sizes = [8, 128], strides = [1, 1]} : vector<8x512xf32> to vector<8x128xf32>
    %cst_101 = arith.constant 5.000000e-01 : f32
    %249 = vector.broadcast %cst_101 : f32 to vector<8x128xf32>
    %250 = arith.mulf %249, %248 : vector<8x128xf32>
    %251 = math.tanh %250 : vector<8x128xf32>
    %cst_102 = arith.constant 5.000000e-01 : f32
    %252 = vector.broadcast %cst_102 : f32 to vector<8x128xf32>
    %253 = arith.mulf %252, %251 : vector<8x128xf32>
    %cst_103 = arith.constant 5.000000e-01 : f32
    %254 = vector.broadcast %cst_103 : f32 to vector<8x128xf32>
    %255 = arith.addf %253, %254 : vector<8x128xf32>
    %256 = arith.mulf %245, %216 : vector<8x128xf32>
    %257 = arith.mulf %237, %247 : vector<8x128xf32>
    %258 = arith.addf %256, %257 : vector<8x128xf32>
    %259 = math.tanh %258 : vector<8x128xf32>
    %260 = arith.mulf %255, %259 : vector<8x128xf32>
    %cst_104 = arith.constant 0.000000e+00 : f32
    %261 = vector.broadcast %cst_104 : f32 to vector<8x128xf32>
    %262 = arith.maximumf %260, %261 : vector<8x128xf32>
    %263 = arith.index_cast %c5_i32 : i32 to index
    %c0_105 = arith.constant 0 : index
    %c0_106 = arith.constant 0 : index
    %264 = vector.load %arg6[%263, %c0_105, %c0_106] : memref<8x8x128xf32, #tpu.memory_space<vmem>>, vector<1x8x128xf32>
    %265 = vector.shape_cast %264 : vector<1x8x128xf32> to vector<8x128xf32>
    %266 = vector.shape_cast %262 : vector<8x128xf32> to vector<1x8x128xf32>
    tpu.vector_store %arg6[%263, %c0_105, %c0_106], %266 {strides = array<i32>} : memref<8x8x128xf32, #tpu.memory_space<vmem>>, vector<1x8x128xf32>,
    %c6_i32 = arith.constant 6 : i32
    %267 = arith.index_cast %c6_i32 : i32 to index
    %c0_107 = arith.constant 0 : index
    %c0_108 = arith.constant 0 : index
    %268 = vector.load %arg7[%267, %c0_107, %c0_108] : memref<8x8x512xf32, #tpu.memory_space<vmem>>, vector<1x8x512xf32>
    %269 = vector.shape_cast %268 : vector<1x8x512xf32> to vector<8x512xf32>
    %cst_109 = arith.constant dense<0.000000e+00> : vector<8x512xf32>
    %270 = tpu.matmul %260, %12, %cst_109 {dimension_numbers = #tpu.dot_dimension_numbers<[1], [0], [0], [1], [0, 0, 1, 1], [], []>} : vector<8x128xf32>, vector<128x512xf32>, vector<8x512xf32> -> vector<8x512xf32>
    %271 = arith.addf %269, %270 : vector<8x512xf32>
    %272 = vector.extract_strided_slice %271 {offsets = [0, 0], sizes = [8, 128], strides = [1, 1]} : vector<8x512xf32> to vector<8x128xf32>
    %cst_110 = arith.constant 5.000000e-01 : f32
    %273 = vector.broadcast %cst_110 : f32 to vector<8x128xf32>
    %274 = arith.mulf %273, %272 : vector<8x128xf32>
    %275 = math.tanh %274 : vector<8x128xf32>
    %cst_111 = arith.constant 5.000000e-01 : f32
    %276 = vector.broadcast %cst_111 : f32 to vector<8x128xf32>
    %277 = arith.mulf %276, %275 : vector<8x128xf32>
    %cst_112 = arith.constant 5.000000e-01 : f32
    %278 = vector.broadcast %cst_112 : f32 to vector<8x128xf32>
    %279 = arith.addf %277, %278 : vector<8x128xf32>
    %280 = vector.extract_strided_slice %271 {offsets = [0, 128], sizes = [8, 128], strides = [1, 1]} : vector<8x512xf32> to vector<8x128xf32>
    %cst_113 = arith.constant 5.000000e-01 : f32
    %281 = vector.broadcast %cst_113 : f32 to vector<8x128xf32>
    %282 = arith.mulf %281, %280 : vector<8x128xf32>
    %283 = math.tanh %282 : vector<8x128xf32>
    %cst_114 = arith.constant 5.000000e-01 : f32
    %284 = vector.broadcast %cst_114 : f32 to vector<8x128xf32>
    %285 = arith.mulf %284, %283 : vector<8x128xf32>
    %cst_115 = arith.constant 5.000000e-01 : f32
    %286 = vector.broadcast %cst_115 : f32 to vector<8x128xf32>
    %287 = arith.addf %285, %286 : vector<8x128xf32>
    %288 = vector.extract_strided_slice %271 {offsets = [0, 256], sizes = [8, 128], strides = [1, 1]} : vector<8x512xf32> to vector<8x128xf32>
    %289 = math.tanh %288 : vector<8x128xf32>
    %290 = vector.extract_strided_slice %271 {offsets = [0, 384], sizes = [8, 128], strides = [1, 1]} : vector<8x512xf32> to vector<8x128xf32>
    %cst_116 = arith.constant 5.000000e-01 : f32
    %291 = vector.broadcast %cst_116 : f32 to vector<8x128xf32>
    %292 = arith.mulf %291, %290 : vector<8x128xf32>
    %293 = math.tanh %292 : vector<8x128xf32>
    %cst_117 = arith.constant 5.000000e-01 : f32
    %294 = vector.broadcast %cst_117 : f32 to vector<8x128xf32>
    %295 = arith.mulf %294, %293 : vector<8x128xf32>
    %cst_118 = arith.constant 5.000000e-01 : f32
    %296 = vector.broadcast %cst_118 : f32 to vector<8x128xf32>
    %297 = arith.addf %295, %296 : vector<8x128xf32>
    %298 = arith.mulf %287, %258 : vector<8x128xf32>
    %299 = arith.mulf %279, %289 : vector<8x128xf32>
    %300 = arith.addf %298, %299 : vector<8x128xf32>
    %301 = math.tanh %300 : vector<8x128xf32>
    %302 = arith.mulf %297, %301 : vector<8x128xf32>
    %cst_119 = arith.constant 0.000000e+00 : f32
    %303 = vector.broadcast %cst_119 : f32 to vector<8x128xf32>
    %304 = arith.maximumf %302, %303 : vector<8x128xf32>
    %305 = arith.index_cast %c6_i32 : i32 to index
    %c0_120 = arith.constant 0 : index
    %c0_121 = arith.constant 0 : index
    %306 = vector.load %arg6[%305, %c0_120, %c0_121] : memref<8x8x128xf32, #tpu.memory_space<vmem>>, vector<1x8x128xf32>
    %307 = vector.shape_cast %306 : vector<1x8x128xf32> to vector<8x128xf32>
    %308 = vector.shape_cast %304 : vector<8x128xf32> to vector<1x8x128xf32>
    tpu.vector_store %arg6[%305, %c0_120, %c0_121], %308 {strides = array<i32>} : memref<8x8x128xf32, #tpu.memory_space<vmem>>, vector<1x8x128xf32>,
    %c7_i32 = arith.constant 7 : i32
    %309 = arith.index_cast %c7_i32 : i32 to index
    %c0_122 = arith.constant 0 : index
    %c0_123 = arith.constant 0 : index
    %310 = vector.load %arg7[%309, %c0_122, %c0_123] : memref<8x8x512xf32, #tpu.memory_space<vmem>>, vector<1x8x512xf32>
    %311 = vector.shape_cast %310 : vector<1x8x512xf32> to vector<8x512xf32>
    %cst_124 = arith.constant dense<0.000000e+00> : vector<8x512xf32>
    %312 = tpu.matmul %302, %12, %cst_124 {dimension_numbers = #tpu.dot_dimension_numbers<[1], [0], [0], [1], [0, 0, 1, 1], [], []>} : vector<8x128xf32>, vector<128x512xf32>, vector<8x512xf32> -> vector<8x512xf32>
    %313 = arith.addf %311, %312 : vector<8x512xf32>
    %314 = vector.extract_strided_slice %313 {offsets = [0, 0], sizes = [8, 128], strides = [1, 1]} : vector<8x512xf32> to vector<8x128xf32>
    %cst_125 = arith.constant 5.000000e-01 : f32
    %315 = vector.broadcast %cst_125 : f32 to vector<8x128xf32>
    %316 = arith.mulf %315, %314 : vector<8x128xf32>
    %317 = math.tanh %316 : vector<8x128xf32>
    %cst_126 = arith.constant 5.000000e-01 : f32
    %318 = vector.broadcast %cst_126 : f32 to vector<8x128xf32>
    %319 = arith.mulf %318, %317 : vector<8x128xf32>
    %cst_127 = arith.constant 5.000000e-01 : f32
    %320 = vector.broadcast %cst_127 : f32 to vector<8x128xf32>
    %321 = arith.addf %319, %320 : vector<8x128xf32>
    %322 = vector.extract_strided_slice %313 {offsets = [0, 128], sizes = [8, 128], strides = [1, 1]} : vector<8x512xf32> to vector<8x128xf32>
    %cst_128 = arith.constant 5.000000e-01 : f32
    %323 = vector.broadcast %cst_128 : f32 to vector<8x128xf32>
    %324 = arith.mulf %323, %322 : vector<8x128xf32>
    %325 = math.tanh %324 : vector<8x128xf32>
    %cst_129 = arith.constant 5.000000e-01 : f32
    %326 = vector.broadcast %cst_129 : f32 to vector<8x128xf32>
    %327 = arith.mulf %326, %325 : vector<8x128xf32>
    %cst_130 = arith.constant 5.000000e-01 : f32
    %328 = vector.broadcast %cst_130 : f32 to vector<8x128xf32>
    %329 = arith.addf %327, %328 : vector<8x128xf32>
    %330 = vector.extract_strided_slice %313 {offsets = [0, 256], sizes = [8, 128], strides = [1, 1]} : vector<8x512xf32> to vector<8x128xf32>
    %331 = math.tanh %330 : vector<8x128xf32>
    %332 = vector.extract_strided_slice %313 {offsets = [0, 384], sizes = [8, 128], strides = [1, 1]} : vector<8x512xf32> to vector<8x128xf32>
    %cst_131 = arith.constant 5.000000e-01 : f32
    %333 = vector.broadcast %cst_131 : f32 to vector<8x128xf32>
    %334 = arith.mulf %333, %332 : vector<8x128xf32>
    %335 = math.tanh %334 : vector<8x128xf32>
    %cst_132 = arith.constant 5.000000e-01 : f32
    %336 = vector.broadcast %cst_132 : f32 to vector<8x128xf32>
    %337 = arith.mulf %336, %335 : vector<8x128xf32>
    %cst_133 = arith.constant 5.000000e-01 : f32
    %338 = vector.broadcast %cst_133 : f32 to vector<8x128xf32>
    %339 = arith.addf %337, %338 : vector<8x128xf32>
    %340 = arith.mulf %329, %300 : vector<8x128xf32>
    %341 = arith.mulf %321, %331 : vector<8x128xf32>
    %342 = arith.addf %340, %341 : vector<8x128xf32>
    %343 = math.tanh %342 : vector<8x128xf32>
    %344 = arith.mulf %339, %343 : vector<8x128xf32>
    %cst_134 = arith.constant 0.000000e+00 : f32
    %345 = vector.broadcast %cst_134 : f32 to vector<8x128xf32>
    %346 = arith.maximumf %344, %345 : vector<8x128xf32>
    %347 = arith.index_cast %c7_i32 : i32 to index
    %c0_135 = arith.constant 0 : index
    %c0_136 = arith.constant 0 : index
    %348 = vector.load %arg6[%347, %c0_135, %c0_136] : memref<8x8x128xf32, #tpu.memory_space<vmem>>, vector<1x8x128xf32>
    %349 = vector.shape_cast %348 : vector<1x8x128xf32> to vector<8x128xf32>
    %350 = vector.shape_cast %346 : vector<8x128xf32> to vector<1x8x128xf32>
    tpu.vector_store %arg6[%347, %c0_135, %c0_136], %350 {strides = array<i32>} : memref<8x8x128xf32, #tpu.memory_space<vmem>>, vector<1x8x128xf32>,
    %c8_i32 = arith.constant 8 : i32
    %c0_137 = arith.constant 0 : index
    %c0_138 = arith.constant 0 : index
    %351 = vector.load %arg8[%c0_137, %c0_138] : memref<8x128xf32, #tpu.memory_space<vmem>>, vector<8x128xf32>
    tpu.vector_store %arg8[%c0_137, %c0_138], %344 {strides = array<i32>} : memref<8x128xf32, #tpu.memory_space<vmem>>, vector<8x128xf32>,
    %c0_139 = arith.constant 0 : index
    %c0_140 = arith.constant 0 : index
    %352 = vector.load %arg9[%c0_139, %c0_140] : memref<8x128xf32, #tpu.memory_space<vmem>>, vector<8x128xf32>
    tpu.vector_store %arg9[%c0_139, %c0_140], %342 {strides = array<i32>} : memref<8x128xf32, #tpu.memory_space<vmem>>, vector<8x128xf32>,
    return
  }
  func.func @transform_0(%arg0: i32, %arg1: i32) -> (i32, i32, i32) {
    %c0_i32 = arith.constant 0 : i32
    %c0_i32_0 = arith.constant 0 : i32
    return %arg1, %arg0, %c0_i32 : i32, i32, i32
  }
  func.func @transform_1(%arg0: i32, %arg1: i32) -> (i32, i32) {
    %c0_i32 = arith.constant 0 : i32
    %c0_i32_0 = arith.constant 0 : i32
    %c0_i32_1 = arith.constant 0 : i32
    return %c0_i32, %c0_i32_0 : i32, i32
  }
  func.func @transform_2(%arg0: i32, %arg1: i32) -> (i32, i32) {
    %c0_i32 = arith.constant 0 : i32
    %c0_i32_0 = arith.constant 0 : i32
    %c0_i32_1 = arith.constant 0 : i32
    return %c0_i32, %c0_i32_0 : i32, i32
  }
  func.func @transform_3(%arg0: i32, %arg1: i32) -> (i32, i32) {
    %c0_i32 = arith.constant 0 : i32
    %c0_i32_0 = arith.constant 0 : i32
    %c0_i32_1 = arith.constant 0 : i32
    return %c0_i32, %c0_i32_0 : i32, i32
  }
  func.func @transform_4(%arg0: i32, %arg1: i32) -> (i32, i32, i32) {
    %c0_i32 = arith.constant 0 : i32
    %c0_i32_0 = arith.constant 0 : i32
    return %arg1, %arg0, %c0_i32 : i32, i32, i32
  }
}

</mosaic_0001>

<bundles_post_ra>
// kernel: _lambda_.1
= control target key start
LH: loop header
LB: loop body
LE: loop exit
PB: predicated region body
PF: predicated region fallthrough
CT: control target
= control target key end

     0   :  { %9 = vsyncpa [#allocation6], 0  ;;  %s1998_s15 = smov [#allocation5]   ;;  %s3063_s0 = inlined_call_operand.vmem [shape: f32[8,8,16], index: 0, kind: input, shape index: {}]   ;;  %s3064_s1 = inlined_call_operand.vmem [shape: f32[16,512], index: 1, kind: input, shape index: {}]   ;;  %s3065_s2 = inlined_call_operand.hbm [shape: f32[128,512], index: 2, kind: input, shape index: {}]   ;;  %s3066_s3 = inlined_call_operand.vmem [shape: f32[1,512], index: 3, kind: input, shape index: {}]   ;;  %s3067_s4 = inlined_call_operand.vmem [shape: f32[8,8,128], index: 4, kind: output, shape index: {}]  }
   0x1   :  { %s19_s16 = sshll.u32 %s1998_s15, 4  ;;  %s20_s16 = int_to_ptr.vmem [resolvable:$true] %s19_s16 }
   0x2   :  { %s1984_s17 = scalar_lea.vmem %s20_s16, 8192  ;;  %p1989_p1 = scmp.lt.s32.totalorder %s20_s16, %s20_s16 }
   0x3   :  { %p1985_p0 = scmp.ne.s32.totalorder %s20_s16, %s1984_s17  ;;  %p1990_p2 = scmp.lt.s32.totalorder %s1984_s17, %s1984_s17 }
   0x5   :  { %p1991_p3 = por %p1990_p2, %p1989_p1 }
   0x7   :  { %p1992_p4 = pnand %p1991_p3, %p1985_p0 }
   0x9   :  { %1995 = shalt.err (!%p1992_p4)
}
   0xa   :  { %s1999_s18 = smov 512   ;;  %s2000_s19 = smov 32  }
   0xb   :  { %25 = dma.hbm_to_vmem [thread:$0]  %s3065_s2, 8192, %s20_s16, [#allocation6], %s1999_s18, %s1999_s18, %s2000_s19  }
   0xc   :  { %1996 = dma.done.wait [#allocation6], 8192  }
   0xd   :  { %1997 = vsyncadd [#allocation6], 4294959104  ;;  %v3068_v0 = vmov 0.0   ;;  %v42_v1 = vld [vmem:[%s3064_s1 + $0x28] sm:$0xff]  ;;  %v44_v2 = vld [vmem:[%s3064_s1 + $0x38] sm:$0xff]  ;;  %vm75_vm0 = vcmask 130048  }
   0xe   :  { %164 = vmatprep.mubr.f32.mxu0 %v3068_v0  ;;  %277 = vmatprep.mubr.f32.mxu1 %v3068_v0  ;;  %v41_v3 = vld [vmem:[%s3064_s1 + $0x20] sm:$0xff]  ;;  %v43_v4 = vld [vmem:[%s3064_s1 + $0x30] sm:$0xff]  ;;  %v38_v5 = vld [vmem:[%s3064_s1 + $0x8] sm:$0xff] }
   0xf   :  { %128 = vmatprep.subr.mxu0 %v42_v1  ;;  %241 = vmatprep.subr.mxu1 %v44_v2  ;;  %v40_v6 = vld [vmem:[%s3064_s1 + $0x18] sm:$0xff]  ;;  %v37_v7 = vld [vmem:[%s3064_s1] sm:$0xff]  ;;  %v39_v8 = vld [vmem:[%s3064_s1 + $0x10] sm:$0xff] }
  0x10   :  { %129 = vmatpush1.msra.mxu0 %v41_v3  ;;  %242 = vmatpush1.msra.mxu1 %v43_v4  ;;  %v45_v9 = vld [vmem:[%s3063_s0] sm:$0xff]  ;;  %v2059_v10 = vld [vmem:[#allocation5 + $0x1e8] sm:$0xff]  ;;  %v2061_v11 = vld [vmem:[#allocation5 + $0x1f8] sm:$0xff] }
  0x11   :  { %130 = vmatprep.subr.mxu0 %v38_v5  ;;  %243 = vmatprep.subr.mxu1 %v40_v6  ;;  %3160 = vst [vmem:[#allocation8_spill] sm:$0xff] %v2059_v10  ;;  %3161 = vst [vmem:[#allocation9_spill] sm:$0xff] %v2061_v11  ;;  %v2063_v12 = vld [vmem:[#allocation5 + $0x1e0] sm:$0xff]  ;;  %v2065_v13 = vld [vmem:[#allocation5 + $0x1f0] sm:$0xff] }
  0x12   :  { %131 = vmatpush1.msra.mxu0 %v37_v7  ;;  %244 = vmatpush1.msra.mxu1 %v39_v8  ;;  %v2069_v14 = vld [vmem:[#allocation5 + $0x1c8] sm:$0xff]  ;;  %v2071_v15 = vld [vmem:[#allocation5 + $0x1d8] sm:$0xff]  ;;  %v2077_v16 = vld [vmem:[#allocation5 + $0x1c0] sm:$0xff] }
  0x13   :  { %1805 = vmatmul.mubr.msk.f32.vlgmr.msra.gmra.mxu0 %vm75_vm0, %v45_v9  ;;  %1813 = vmatmul.mubr.msk.f32.vlgmr.msra.gmra.mxu1 %vm75_vm0, %v45_v9  ;;  %v2079_v17 = vld [vmem:[#allocation5 + $0x1d0] sm:$0xff]  ;;  %v46_v18 = vld [vmem:[%s3063_s0 + $0x8] sm:$0xff]  ;;  %v2090_v20 = vld [vmem:[#allocation5 + $0x1b8] sm:$0xff] }
  0x14   :  { %428 = vmatprep.subr.mxu0 %v2059_v10  ;;  %499 = vmatprep.subr.mxu1 %v2061_v11  ;;  %v2088_v19 = vld [vmem:[#allocation5 + $0x1a8] sm:$0xff]  ;;  %v2094_v21 = vld [vmem:[#allocation5 + $0x1a0] sm:$0xff]  ;;  %v2096_v22 = vld [vmem:[#allocation5 + $0x1b0] sm:$0xff] }
  0x15   :  { %429 = vmatpush1.msra.mxu0 %v2063_v12  ;;  %500 = vmatpush1.msra.mxu1 %v2065_v13  ;;  %v2100_v23 = vld [vmem:[#allocation5 + $0x188] sm:$0xff]  ;;  %v2102_v24 = vld [vmem:[#allocation5 + $0x198] sm:$0xff]  ;;  %v2108_v25 = vld [vmem:[#allocation5 + $0x180] sm:$0xff] }
  0x16   :  { %430 = vmatprep.subr.mxu0 %v2069_v14  ;;  %501 = vmatprep.subr.mxu1 %v2071_v15  ;;  %v2110_v26 = vld [vmem:[#allocation5 + $0x190] sm:$0xff]  ;;  %v2119_v28 = vld [vmem:[#allocation5 + $0x168] sm:$0xff]  ;;  %v2121_v29 = vld [vmem:[#allocation5 + $0x178] sm:$0xff] }
  0x17   :  { %170 = vmatprep.mubr.f32.mxu0 %v3068_v0  ;;  %283 = vmatprep.mubr.f32.mxu1 %v3068_v0  ;;  %v47_v27 = vld [vmem:[%s3063_s0 + $0x10] sm:$0xff]  ;;  %v2125_v30 = vld [vmem:[#allocation5 + $0x160] sm:$0xff]  ;;  %v2131_v32 = vld [vmem:[#allocation5 + $0x148] sm:$0xff] }
  0x18   :  { %431 = vmatpush1.msra.mxu0 %v2077_v16  ;;  %502 = vmatpush1.msra.mxu1 %v2079_v17  ;;  %v2127_v31 = vld [vmem:[#allocation5 + $0x170] sm:$0xff]  ;;  %v2133_v33 = vld [vmem:[#allocation5 + $0x158] sm:$0xff]  ;;  %v2139_v34 = vld [vmem:[#allocation5 + $0x140] sm:$0xff] }
  0x19   :  { %1806 = vmatmul.mubr.msk.f32.gmra.mxu0 %vm75_vm0, %v46_v18  ;;  %1814 = vmatmul.mubr.msk.f32.gmra.mxu1 %vm75_vm0, %v46_v18  ;;  %v2141_v35 = vld [vmem:[#allocation5 + $0x150] sm:$0xff]  ;;  %v48_v36 = vld [vmem:[%s3063_s0 + $0x18] sm:$0xff]  ;;  %v2150_v37 = vld [vmem:[#allocation5 + $0x128] sm:$0xff] }
  0x1a   :  { %432 = vmatprep.subr.mxu0 %v2088_v19  ;;  %503 = vmatprep.subr.mxu1 %v2090_v20  ;;  %v2152_v38 = vld [vmem:[#allocation5 + $0x138] sm:$0xff]  ;;  %v2156_v39 = vld [vmem:[#allocation5 + $0x120] sm:$0xff]  ;;  %v2158_v40 = vld [vmem:[#allocation5 + $0x130] sm:$0xff] }
  0x1b   :  { %433 = vmatpush1.msra.mxu0 %v2094_v21  ;;  %504 = vmatpush1.msra.mxu1 %v2096_v22  ;;  %v2162_v41 = vld [vmem:[#allocation5 + $0x108] sm:$0xff]  ;;  %v2164_v42 = vld [vmem:[#allocation5 + $0x118] sm:$0xff]  ;;  %v2170_v43 = vld [vmem:[#allocation5 + $0x100] sm:$0xff] }
  0x1c   :  { %434 = vmatprep.subr.mxu0 %v2100_v23  ;;  %505 = vmatprep.subr.mxu1 %v2102_v24  ;;  %v2172_v44 = vld [vmem:[#allocation5 + $0x110] sm:$0xff]  ;;  %v49_v45 = vld [vmem:[%s3063_s0 + $0x20] sm:$0xff]  ;;  %v2181_v46 = vld [vmem:[#allocation5 + $0xe8] sm:$0xff] }
  0x1d   :  { %176 = vmatprep.mubr.f32.mxu0 %v3068_v0  ;;  %289 = vmatprep.mubr.f32.mxu1 %v3068_v0  ;;  %v2183_v47 = vld [vmem:[#allocation5 + $0xf8] sm:$0xff]  ;;  %v2187_v48 = vld [vmem:[#allocation5 + $0xe0] sm:$0xff]  ;;  %v2189_v49 = vld [vmem:[#allocation5 + $0xf0] sm:$0xff] }
  0x1e   :  { %435 = vmatpush1.msra.mxu0 %v2108_v25  ;;  %506 = vmatpush1.msra.mxu1 %v2110_v26  ;;  %v2193_v50 = vld [vmem:[#allocation5 + $0xc8] sm:$0xff]  ;;  %v2195_v51 = vld [vmem:[#allocation5 + $0xd8] sm:$0xff]  ;;  %v2201_v52 = vld [vmem:[#allocation5 + $0xc0] sm:$0xff] }
  0x1f   :  { %1807 = vmatmul.mubr.msk.f32.gmra.mxu0 %vm75_vm0, %v47_v27  ;;  %1815 = vmatmul.mubr.msk.f32.gmra.mxu1 %vm75_vm0, %v47_v27  ;;  %v2203_v53 = vld [vmem:[#allocation5 + $0xd0] sm:$0xff]  ;;  %v50_v54 = vld [vmem:[%s3063_s0 + $0x28] sm:$0xff]  ;;  %v2214_v56 = vld [vmem:[#allocation5 + $0xb8] sm:$0xff] }
  0x20   :  { %436 = vmatprep.subr.mxu0 %v2119_v28  ;;  %507 = vmatprep.subr.mxu1 %v2121_v29  ;;  %v2212_v55 = vld [vmem:[#allocation5 + $0xa8] sm:$0xff]  ;;  %v2218_v57 = vld [vmem:[#allocation5 + $0xa0] sm:$0xff]  ;;  %v2220_v58 = vld [vmem:[#allocation5 + $0xb0] sm:$0xff] }
  0x21   :  { %437 = vmatpush1.msra.mxu0 %v2125_v30  ;;  %508 = vmatpush1.msra.mxu1 %v2127_v31  ;;  %v2224_v59 = vld [vmem:[#allocation5 + $0x88] sm:$0xff]  ;;  %v2226_v60 = vld [vmem:[#allocation5 + $0x98] sm:$0xff]  ;;  %v2232_v61 = vld [vmem:[#allocation5 + $0x80] sm:$0xff] }
  0x22   :  { %438 = vmatprep.subr.mxu0 %v2131_v32  ;;  %509 = vmatprep.subr.mxu1 %v2133_v33  ;;  %3162 = vst [vmem:[#allocation10_spill] sm:$0xff] %v2224_v59  ;;  %3163 = vst [vmem:[#allocation11_spill] sm:$0xff] %v2226_v60  ;;  %v2234_v62 = vld [vmem:[#allocation5 + $0x90] sm:$0xff]  ;;  %v2243_v1 = vld [vmem:[#allocation5 + $0x68] sm:$0xff] }
  0x23   :  { %182 = vmatprep.mubr.f32.mxu0 %v3068_v0  ;;  %295 = vmatprep.mubr.f32.mxu1 %v3068_v0  ;;  %3164 = vst [vmem:[#allocation12_spill] sm:$0xff] %v2232_v61  ;;  %3165 = vst [vmem:[#allocation13_spill] sm:$0xff] %v2234_v62  ;;  %v51_v63 = vld [vmem:[%s3063_s0 + $0x30] sm:$0xff]  ;;  %v2245_v2 = vld [vmem:[#allocation5 + $0x78] sm:$0xff] }
  0x24   :  { %439 = vmatpush1.msra.mxu0 %v2139_v34  ;;  %510 = vmatpush1.msra.mxu1 %v2141_v35  ;;  %3166 = vst [vmem:[#allocation14_spill] sm:$0xff] %v2243_v1  ;;  %3167 = vst [vmem:[#allocation15_spill] sm:$0xff] %v2245_v2  ;;  %v2249_v3 = vld [vmem:[#allocation5 + $0x60] sm:$0xff]  ;;  %v2251_v4 = vld [vmem:[#allocation5 + $0x70] sm:$0xff] }
  0x25   :  { %1808 = vmatmul.mubr.msk.f32.gmra.mxu0 %vm75_vm0, %v48_v36  ;;  %1816 = vmatmul.mubr.msk.f32.gmra.mxu1 %vm75_vm0, %v48_v36  ;;  %3168 = vst [vmem:[#allocation16_spill] sm:$0xff] %v2249_v3  ;;  %3169 = vst [vmem:[#allocation17_spill] sm:$0xff] %v2251_v4  ;;  %v2255_v5 = vld [vmem:[#allocation5 + $0x48] sm:$0xff]  ;;  %v2257_v6 = vld [vmem:[#allocation5 + $0x58] sm:$0xff] }
  0x26   :  { %440 = vmatprep.subr.mxu0 %v2150_v37  ;;  %511 = vmatprep.subr.mxu1 %v2152_v38  ;;  %3170 = vst [vmem:[#allocation18_spill] sm:$0xff] %v2255_v5  ;;  %3171 = vst [vmem:[#allocation19_spill] sm:$0xff] %v2257_v6  ;;  %v2263_v7 = vld [vmem:[#allocation5 + $0x40] sm:$0xff]  ;;  %v2265_v8 = vld [vmem:[#allocation5 + $0x50] sm:$0xff] }
  0x27   :  { %441 = vmatpush1.msra.mxu0 %v2156_v39  ;;  %512 = vmatpush1.msra.mxu1 %v2158_v40  ;;  %3172 = vst [vmem:[#allocation20_spill] sm:$0xff] %v2263_v7  ;;  %3173 = vst [vmem:[#allocation21_spill] sm:$0xff] %v2265_v8  ;;  %v52_v9 = vld [vmem:[%s3063_s0 + $0x38] sm:$0xff]  ;;  %v2274_v18 = vld [vmem:[#allocation5 + $0x28] sm:$0xff] }
  0x28   :  { %442 = vmatprep.subr.mxu0 %v2162_v41  ;;  %513 = vmatprep.subr.mxu1 %v2164_v42  ;;  %3174 = vst [vmem:[#allocation22_spill] sm:$0xff] %v2274_v18  ;;  %v2276_v27 = vld [vmem:[#allocation5 + $0x38] sm:$0xff]  ;;  %v2280_v36 = vld [vmem:[#allocation5 + $0x20] sm:$0xff] }
  0x29   :  { %188 = vmatprep.mubr.f32.mxu0 %v3068_v0  ;;  %301 = vmatprep.mubr.f32.mxu1 %v3068_v0  ;;  %3175 = vst [vmem:[#allocation23_spill] sm:$0xff] %v2276_v27  ;;  %3176 = vst [vmem:[#allocation24_spill] sm:$0xff] %v2280_v36 }
  0x2a   :  { %443 = vmatpush1.msra.mxu0 %v2170_v43  ;;  %514 = vmatpush1.msra.mxu1 %v2172_v44 }
  0x2b   :  { %1809 = vmatmul.mubr.msk.f32.gmra.mxu0 %vm75_vm0, %v49_v45  ;;  %1817 = vmatmul.mubr.msk.f32.gmra.mxu1 %vm75_vm0, %v49_v45  ;;  %v2282_v45 = vld [vmem:[#allocation5 + $0x30] sm:$0xff] }
  0x2c   :  { %444 = vmatprep.subr.mxu0 %v2181_v46  ;;  %515 = vmatprep.subr.mxu1 %v2183_v47  ;;  %3177 = vst [vmem:[#allocation25_spill] sm:$0xff] %v2282_v45 }
  0x2d   :  { %445 = vmatpush1.msra.mxu0 %v2187_v48  ;;  %516 = vmatpush1.msra.mxu1 %v2189_v49 }
  0x2e   :  { %446 = vmatprep.subr.mxu0 %v2193_v50  ;;  %517 = vmatprep.subr.mxu1 %v2195_v51 }
  0x2f   :  { %194 = vmatprep.mubr.f32.mxu0 %v3068_v0  ;;  %307 = vmatprep.mubr.f32.mxu1 %v3068_v0 }
  0x30   :  { %447 = vmatpush1.msra.mxu0 %v2201_v52  ;;  %518 = vmatpush1.msra.mxu1 %v2203_v53 }
  0x31   :  { %1810 = vmatmul.mubr.msk.f32.gmra.mxu0 %vm75_vm0, %v50_v54  ;;  %1818 = vmatmul.mubr.msk.f32.gmra.mxu1 %vm75_vm0, %v50_v54  ;;  %v2286_v54 = vld [vmem:[#allocation5 + $0x8] sm:$0xff] }
  0x32   :  { %448 = vmatprep.subr.mxu0 %v2212_v55  ;;  %519 = vmatprep.subr.mxu1 %v2214_v56  ;;  %3178 = vst [vmem:[#allocation26_spill] sm:$0xff] %v2286_v54 }
  0x33   :  { %449 = vmatpush1.msra.mxu0 %v2218_v57  ;;  %520 = vmatpush1.msra.mxu1 %v2220_v58 }
  0x34   :  { %450 = vmatprep.subr.mxu0 %v2224_v59  ;;  %521 = vmatprep.subr.mxu1 %v2226_v60 }
  0x35   :  { %200 = vmatprep.mubr.f32.mxu0 %v3068_v0  ;;  %313 = vmatprep.mubr.f32.mxu1 %v3068_v0 }
  0x36   :  { %451 = vmatpush1.msra.mxu0 %v2232_v61  ;;  %522 = vmatpush1.msra.mxu1 %v2234_v62 }
  0x37   :  { %1811 = vmatmul.mubr.msk.f32.gmra.mxu0 %vm75_vm0, %v51_v63  ;;  %1819 = vmatmul.mubr.msk.f32.gmra.mxu1 %vm75_vm0, %v51_v63  ;;  %v2288_v63 = vld [vmem:[#allocation5 + $0x18] sm:$0xff] }
  0x38   :  { %452 = vmatprep.subr.mxu0 %v2243_v1  ;;  %523 = vmatprep.subr.mxu1 %v2245_v2  ;;  %3179 = vst [vmem:[#allocation27_spill] sm:$0xff] %v2288_v63 }
  0x39   :  { %453 = vmatpush1.msra.mxu0 %v2249_v3  ;;  %524 = vmatpush1.msra.mxu1 %v2251_v4 }
  0x3a   :  { %454 = vmatprep.subr.mxu0 %v2255_v5  ;;  %525 = vmatprep.subr.mxu1 %v2257_v6 }
  0x3b   :  { %206 = vmatprep.mubr.f32.mxu0 %v3068_v0  ;;  %319 = vmatprep.mubr.f32.mxu1 %v3068_v0  ;;  %v2292_v0 = vld [vmem:[#allocation5] sm:$0xff] }
  0x3c   :  { %455 = vmatpush1.msra.mxu0 %v2263_v7  ;;  %526 = vmatpush1.msra.mxu1 %v2265_v8  ;;  %3180 = vst [vmem:[#allocation28_spill] sm:$0xff] %v2292_v0  ;;  %v2296_v8 = vld [vmem:[#allocation5 + $0x10] sm:$0xff] }
  0x3d   :  { %1812 = vmatmul.mubr.msk.f32.gmra.mxu0 %vm75_vm0, %v52_v9  ;;  %1820 = vmatmul.mubr.msk.f32.gmra.mxu1 %vm75_vm0, %v52_v9  ;;  %3181 = vst [vmem:[#allocation29_spill] sm:$0xff] %v2296_v8  ;;  %v3182_v9 = vmov 0.0  }
  0x3e   :  { %456 = vmatprep.subr.mxu0 %v2274_v18  ;;  %527 = vmatprep.subr.mxu1 %v2276_v27 }
  0x3f   :  { %457 = vmatpush1.msra.mxu0 %v2280_v36  ;;  %528 = vmatpush1.msra.mxu1 %v2282_v45 }
  0x40   :  { %458 = vmatprep.subr.mxu0 %v2286_v54  ;;  %529 = vmatprep.subr.mxu1 %v2288_v63 }
  0x41   :  { %459 = vmatpush1.msra.mxu0 %v2292_v0  ;;  %492 = vmatprep.mubr.f32.mxu0 %v3182_v9 }
  0x42   :  { %530 = vmatpush1.msra.mxu1 %v2296_v8  ;;  %563 = vmatprep.mubr.f32.mxu1 %v3182_v9 }
  0x43   :  { %493 = vmatmul.mubr.f32.vlgmr.msra.gmra.mxu0 %v3182_v9  ;;  %564 = vmatmul.mubr.f32.vlgmr.msra.gmra.mxu1 %v3182_v9 }
  0x44   :  { %599 = vmatprep.subr.mxu0 %v2059_v10  ;;  %670 = vmatprep.subr.mxu1 %v2061_v11 }
  0x45   :  { %600 = vmatpush1.msra.mxu0 %v2063_v12  ;;  %671 = vmatpush1.msra.mxu1 %v2065_v13 }
  0x46   :  { %601 = vmatprep.subr.mxu0 %v2069_v14  ;;  %672 = vmatprep.subr.mxu1 %v2071_v15 }
  0x47   :  { %602 = vmatpush1.msra.mxu0 %v2077_v16  ;;  %673 = vmatpush1.msra.mxu1 %v2079_v17 }
  0x48   :  { %603 = vmatprep.subr.mxu0 %v2088_v19  ;;  %674 = vmatprep.subr.mxu1 %v2090_v20 }
  0x49   :  { %604 = vmatpush1.msra.mxu0 %v2094_v21  ;;  %675 = vmatpush1.msra.mxu1 %v2096_v22 }
  0x4a   :  { %605 = vmatprep.subr.mxu0 %v2100_v23  ;;  %676 = vmatprep.subr.mxu1 %v2102_v24 }
  0x4b   :  { %606 = vmatpush1.msra.mxu0 %v2108_v25  ;;  %677 = vmatpush1.msra.mxu1 %v2110_v26 }
  0x4c   :  { %607 = vmatprep.subr.mxu0 %v2119_v28  ;;  %678 = vmatprep.subr.mxu1 %v2121_v29 }
  0x4d   :  { %608 = vmatpush1.msra.mxu0 %v2125_v30  ;;  %679 = vmatpush1.msra.mxu1 %v2127_v31 }
  0x4e   :  { %609 = vmatprep.subr.mxu0 %v2131_v32  ;;  %680 = vmatprep.subr.mxu1 %v2133_v33 }
  0x4f   :  { %610 = vmatpush1.msra.mxu0 %v2139_v34  ;;  %681 = vmatpush1.msra.mxu1 %v2141_v35 }
  0x50   :  { %611 = vmatprep.subr.mxu0 %v2150_v37  ;;  %682 = vmatprep.subr.mxu1 %v2152_v38 }
  0x51   :  { %612 = vmatpush1.msra.mxu0 %v2156_v39  ;;  %683 = vmatpush1.msra.mxu1 %v2158_v40 }
  0x52   :  { %613 = vmatprep.subr.mxu0 %v2162_v41  ;;  %684 = vmatprep.subr.mxu1 %v2164_v42 }
  0x53   :  { %614 = vmatpush1.msra.mxu0 %v2170_v43  ;;  %685 = vmatpush1.msra.mxu1 %v2172_v44 }
  0x54   :  { %615 = vmatprep.subr.mxu0 %v2181_v46  ;;  %686 = vmatprep.subr.mxu1 %v2183_v47 }
  0x55   :  { %616 = vmatpush1.msra.mxu0 %v2187_v48  ;;  %687 = vmatpush1.msra.mxu1 %v2189_v49 }
  0x56   :  { %617 = vmatprep.subr.mxu0 %v2193_v50  ;;  %688 = vmatprep.subr.mxu1 %v2195_v51 }
  0x57   :  { %618 = vmatpush1.msra.mxu0 %v2201_v52  ;;  %689 = vmatpush1.msra.mxu1 %v2203_v53 }
  0x58   :  { %619 = vmatprep.subr.mxu0 %v2212_v55  ;;  %690 = vmatprep.subr.mxu1 %v2214_v56 }
  0x59   :  { %620 = vmatpush1.msra.mxu0 %v2218_v57  ;;  %691 = vmatpush1.msra.mxu1 %v2220_v58 }
  0x5a   :  { %621 = vmatprep.subr.mxu0 %v2224_v59  ;;  %692 = vmatprep.subr.mxu1 %v2226_v60  ;;  %v3183_v59 = vld [vmem:[#allocation21_spill] sm:$0xff] }
  0x5b   :  { %622 = vmatpush1.msra.mxu0 %v2232_v61  ;;  %693 = vmatpush1.msra.mxu1 %v2234_v62 }
  0x5c   :  { %623 = vmatprep.subr.mxu0 %v2243_v1  ;;  %694 = vmatprep.subr.mxu1 %v2245_v2 }
  0x5d   :  { %624 = vmatpush1.msra.mxu0 %v2249_v3  ;;  %695 = vmatpush1.msra.mxu1 %v2251_v4 }
  0x5e   :  { %625 = vmatprep.subr.mxu0 %v2255_v5  ;;  %696 = vmatprep.subr.mxu1 %v2257_v6 }
  0x5f   :  { %626 = vmatpush1.msra.mxu0 %v2263_v7  ;;  %697 = vmatpush1.msra.mxu1 %v3183_v59 }
  0x60   :  { %627 = vmatprep.subr.mxu0 %v2274_v18  ;;  %698 = vmatprep.subr.mxu1 %v2276_v27  ;;  %v55_v27 = vlaneseq }
  0x61   :  { %628 = vmatpush1.msra.mxu0 %v2280_v36  ;;  %699 = vmatpush1.msra.mxu1 %v2282_v45 }
  0x62   :  { %629 = vmatprep.subr.mxu0 %v2286_v54  ;;  %700 = vmatprep.subr.mxu1 %v2288_v63  ;;  %v56_v36 = vshrl.u32 %v55_v27, 7 }
  0x63   :  { %630 = vmatpush1.msra.mxu0 %v2292_v0  ;;  %663 = vmatprep.mubr.f32.mxu0 %v3182_v9  ;;  %v53_v0 = vld [vmem:[%s3066_s3] sm:$0xf] }
  0x64   :  { %701 = vmatpush1.msra.mxu1 %v2296_v8  ;;  %734 = vmatprep.mubr.f32.mxu1 %v3182_v9  ;;  %v57_v54 = vsub.s32 0, %v56_v36  ;;  %v65_v63 = vsub.s32 2, %v56_v36  ;;  %v61_v9 = vsub.s32 1, %v56_v36 }
  0x65   :  { %771 = vmatprep.subr.mxu0 %v2059_v10  ;;  %842 = vmatprep.subr.mxu1 %v2061_v11  ;;  %v69_v10 = vsub.s32 3, %v56_v36 }
  0x66   :  { %v58_v7 = vrot.slane %v53_v0, %v57_v54  ;;  %v2385_v11 = vrot.slane %v53_v0, %v65_v63  ;;  %v62_v5 = vrot.slane %v53_v0, %v61_v9 }
  0x67   :  { %v2387_v4 = vrot.slane %v53_v0, %v69_v10 }
  0xd3   :  { %v2374_v18 = vpop.f32.mrf.mxu0  ;;  %v2376_v45 = vpop.f32.mrf.mxu1 }
  0xd5   :  { %v2381_v59 = vpop.f32.mrf.mxu0  ;;  %v2383_v8 = vpop.f32.mrf.mxu1 }
  0xd9   :  { %v172_v27 = vpop.f32.mrf.mxu0  ;;  %v285_v6 = vpop.f32.mrf.mxu1 }
  0xda   :  { %v2389_v3 = vadd.f32 %v172_v27, %v58_v7  ;;  %v2392_v2 = vadd.f32 %v285_v6, %v2385_v11 }
  0xdb   :  { %v174_v1 = vpop.f32.mrf.mxu0  ;;  %v287_v62 = vpop.f32.mrf.mxu1 }
  0xdc   :  { %3184 = vst [vmem:[#allocation30_spill] sm:$0xff] %v2389_v3  ;;  %3185 = vst [vmem:[#allocation31_spill] sm:$0xff] %v2392_v2  ;;  %v2394_v61 = vadd.f32 %v174_v1, %v62_v5  ;;  %v2397_v60 = vadd.f32 %v287_v62, %v2387_v4 }
  0xde   :  { %3186 = vst [vmem:[#allocation32_spill] sm:$0xff] %v2394_v61  ;;  %3187 = vst [vmem:[#allocation33_spill] sm:$0xff] %v2397_v60 }
  0xdf   :  { %v178_v36 = vpop.f32.mrf.mxu0  ;;  %v291_v54 = vpop.f32.mrf.mxu1 }
  0xe0   :  { %v2399_v63 = vadd.f32 %v178_v36, %v58_v7  ;;  %v2402_v9 = vadd.f32 %v291_v54, %v2385_v11 }
  0xe1   :  { %v180_v0 = vpop.f32.mrf.mxu0  ;;  %v293_v10 = vpop.f32.mrf.mxu1 }
  0xe2   :  { %3188 = vst [vmem:[#allocation34_spill] sm:$0xff] %v2399_v63  ;;  %3189 = vst [vmem:[#allocation35_spill] sm:$0xff] %v2402_v9  ;;  %v2404_v27 = vadd.f32 %v180_v0, %v62_v5  ;;  %v2407_v6 = vadd.f32 %v293_v10, %v2387_v4 }
  0xe4   :  { %3190 = vst [vmem:[#allocation36_spill] sm:$0xff] %v2404_v27  ;;  %3191 = vst [vmem:[#allocation37_spill] sm:$0xff] %v2407_v6 }
  0xe5   :  { %v184_v2 = vpop.f32.mrf.mxu0  ;;  %v297_v1 = vpop.f32.mrf.mxu1 }
  0xe6   :  { %v2409_v61 = vadd.f32 %v184_v2, %v58_v7  ;;  %v2412_v62 = vadd.f32 %v297_v1, %v2385_v11 }
  0xe7   :  { %v186_v60 = vpop.f32.mrf.mxu0  ;;  %v299_v36 = vpop.f32.mrf.mxu1 }
  0xe8   :  { %3192 = vst [vmem:[#allocation38_spill] sm:$0xff] %v2409_v61  ;;  %3193 = vst [vmem:[#allocation39_spill] sm:$0xff] %v2412_v62  ;;  %v2414_v63 = vadd.f32 %v186_v60, %v62_v5  ;;  %v2417_v54 = vadd.f32 %v299_v36, %v2387_v4 }
  0xea   :  { %3194 = vst [vmem:[#allocation40_spill] sm:$0xff] %v2414_v63  ;;  %3195 = vst [vmem:[#allocation41_spill] sm:$0xff] %v2417_v54 }
  0xeb   :  { %v190_v9 = vpop.f32.mrf.mxu0  ;;  %v303_v0 = vpop.f32.mrf.mxu1 }
  0xec   :  { %v2419_v27 = vadd.f32 %v190_v9, %v58_v7  ;;  %v2422_v10 = vadd.f32 %v303_v0, %v2385_v11 }
  0xed   :  { %v192_v6 = vpop.f32.mrf.mxu0  ;;  %v305_v2 = vpop.f32.mrf.mxu1 }
  0xee   :  { %3196 = vst [vmem:[#allocation42_spill] sm:$0xff] %v2419_v27  ;;  %3197 = vst [vmem:[#allocation43_spill] sm:$0xff] %v2422_v10  ;;  %v2424_v61 = vadd.f32 %v192_v6, %v62_v5  ;;  %v2427_v1 = vadd.f32 %v305_v2, %v2387_v4 }
  0xf0   :  { %3198 = vst [vmem:[#allocation44_spill] sm:$0xff] %v2424_v61  ;;  %3199 = vst [vmem:[#allocation45_spill] sm:$0xff] %v2427_v1 }
  0xf1   :  { %v196_v62 = vpop.f32.mrf.mxu0  ;;  %v309_v60 = vpop.f32.mrf.mxu1 }
  0xf2   :  { %v2429_v63 = vadd.f32 %v196_v62, %v58_v7  ;;  %v2432_v36 = vadd.f32 %v309_v60, %v2385_v11 }
  0xf3   :  { %v198_v54 = vpop.f32.mrf.mxu0  ;;  %v311_v9 = vpop.f32.mrf.mxu1 }
  0xf4   :  { %3200 = vst [vmem:[#allocation46_spill] sm:$0xff] %v2429_v63  ;;  %3201 = vst [vmem:[#allocation47_spill] sm:$0xff] %v2432_v36  ;;  %v2434_v27 = vadd.f32 %v198_v54, %v62_v5  ;;  %v2437_v0 = vadd.f32 %v311_v9, %v2387_v4 }
  0xf6   :  { %3202 = vst [vmem:[#allocation48_spill] sm:$0xff] %v2434_v27  ;;  %3203 = vst [vmem:[#allocation49_spill] sm:$0xff] %v2437_v0 }
  0xf7   :  { %v202_v10 = vpop.f32.mrf.mxu0  ;;  %v315_v6 = vpop.f32.mrf.mxu1 }
  0xf8   :  { %v2439_v61 = vadd.f32 %v202_v10, %v58_v7  ;;  %v2442_v2 = vadd.f32 %v315_v6, %v2385_v11 }
  0xf9   :  { %v204_v1 = vpop.f32.mrf.mxu0  ;;  %v317_v62 = vpop.f32.mrf.mxu1 }
  0xfa   :  { %3204 = vst [vmem:[#allocation50_spill] sm:$0xff] %v2439_v61  ;;  %3205 = vst [vmem:[#allocation51_spill] sm:$0xff] %v2442_v2  ;;  %v2444_v63 = vadd.f32 %v204_v1, %v62_v5  ;;  %v2447_v60 = vadd.f32 %v317_v62, %v2387_v4  ;;  %v167_v1 = vadd.f32 %v2374_v18, %v58_v7 }
  0xfb   :  { %v169_v62 = vadd.f32 %v2381_v59, %v62_v5 }
  0xfc   :  { %3206 = vst [vmem:[#allocation52_spill] sm:$0xff] %v2444_v63  ;;  %3207 = vst [vmem:[#allocation53_spill] sm:$0xff] %v2447_v60 }
  0xfd   :  { %v208_v36 = vpop.f32.mrf.mxu0  ;;  %v321_v54 = vpop.f32.mrf.mxu1 }
  0xfe   :  { %v2449_v27 = vadd.f32 %v208_v36, %v58_v7  ;;  %v2452_v9 = vadd.f32 %v321_v54, %v2385_v11  ;;  %v280_v54 = vadd.f32 %v2376_v45, %v2385_v11 }
  0xff   :  { %v210_v0 = vpop.f32.mrf.mxu0  ;;  %v323_v10 = vpop.f32.mrf.mxu1 }
 0x100   :  { %3208 = vst [vmem:[#allocation54_spill] sm:$0xff] %v2449_v27  ;;  %3209 = vst [vmem:[#allocation55_spill] sm:$0xff] %v2452_v9  ;;  %v2454_v61 = vadd.f32 %v210_v0, %v62_v5  ;;  %v2457_v6 = vadd.f32 %v323_v10, %v2387_v4  ;;  %v282_v10 = vadd.f32 %v2383_v8, %v2387_v4 }
 0x102   :  { %3210 = vst [vmem:[#allocation56_spill] sm:$0xff] %v2454_v61  ;;  %3211 = vst [vmem:[#allocation57_spill] sm:$0xff] %v2457_v6  ;;  %v3232_v6 = vld [vmem:[#allocation29_spill] sm:$0xff] }
 0x103   :  { %v494_v2 = vpop.f32.mrf.mxu0  ;;  %v565_v27 = vpop.f32.mrf.mxu1 }
 0x104   :  { %v570_v60 = vadd.f32 %v494_v2, %v167_v1  ;;  %v572_v0 = vadd.f32 %v565_v27, %v280_v54  ;;  %v3212_v54 = vld [vmem:[#allocation10_spill] sm:$0xff] }
 0x105   :  { %v496_v63 = vpop.f32.mrf.mxu0  ;;  %v567_v61 = vpop.f32.mrf.mxu1 }
 0x106   :  { %v574_v3 = vmul.f32 0.5, %v570_v60  ;;  %v571_v36 = vadd.f32 %v496_v63, %v169_v62  ;;  %v573_v7 = vadd.f32 %v567_v61, %v282_v10  ;;  %v3214_v10 = vld [vmem:[#allocation12_spill] sm:$0xff] }
 0x108   :  { %1832 = vtanh.f32 %v574_v3  ;;  %v578_v9 = vmul.f32 0.5, %v571_v36  ;;  %v583_v18 = vmul.f32 0.5, %v573_v7  ;;  %v3215_v7 = vld [vmem:[#allocation13_spill] sm:$0xff] }
 0x10a   :  { %1834 = vtanh.f32 %v578_v9 }
 0x10b   :  { %1836 = vtanh.f32 %v572_v0  ;;  %v3213_v0 = vld [vmem:[#allocation11_spill] sm:$0xff] }
 0x10c   :  { %1838 = vtanh.f32 %v583_v18  ;;  %v3216_v18 = vld [vmem:[#allocation14_spill] sm:$0xff] }
 0x115   :  { %v1833_v59 = vpop.eup %1832 }
 0x116   :  { %v576_v5 = vmul.f32 0.5, %v1833_v59  ;;  %v3217_v59 = vld [vmem:[#allocation15_spill] sm:$0xff] }
 0x117   :  { %v1835_v2 = vpop.eup %1834 }
 0x118   :  { %v577_v60 = vadd.f32 0.5, %v576_v5  ;;  %v580_v63 = vmul.f32 0.5, %v1835_v2  ;;  %v1837_v62 = vpop.eup %1836  ;;  %v3218_v5 = vld [vmem:[#allocation16_spill] sm:$0xff]  ;;  %v3219_v2 = vld [vmem:[#allocation17_spill] sm:$0xff] }
 0x119   :  { %v1839_v27 = vpop.eup %1838 }
 0x11a   :  { %v581_v1 = vadd.f32 0.5, %v580_v63  ;;  %v588_v3 = vmul.f32 %v1837_v62, %v577_v60  ;;  %v585_v9 = vmul.f32 0.5, %v1839_v27  ;;  %v3220_v60 = vld [vmem:[#allocation18_spill] sm:$0xff]  ;;  %v3221_v63 = vld [vmem:[#allocation19_spill] sm:$0xff]  ;;  %v3223_v62 = vld [vmem:[#allocation21_spill] sm:$0xff] }
 0x11b   :  { %v3226_v27 = vld [vmem:[#allocation24_spill] sm:$0xff] }
 0x11c   :  { %v587_v11 = vmul.f32 0.0, %v581_v1  ;;  %v586_v4 = vadd.f32 0.5, %v585_v9  ;;  %v3222_v1 = vld [vmem:[#allocation20_spill] sm:$0xff]  ;;  %v3227_v9 = vld [vmem:[#allocation25_spill] sm:$0xff] }
 0x11e   :  { %v2465_v45 = vadd.f32 %v588_v3, %v587_v11  ;;  %v3224_v11 = vld [vmem:[#allocation22_spill] sm:$0xff]  ;;  %v3225_v3 = vld [vmem:[#allocation23_spill] sm:$0xff] }
 0x120   :  { %1840 = vtanh.f32 %v2465_v45 }
 0x12d   :  { %v1841_v8 = vpop.eup %1840 }
 0x12e   :  { %v591_v61 = vmul.f32 %v1841_v8, %v586_v4  ;;  %v3228_v4 = vld [vmem:[#allocation26_spill] sm:$0xff]  ;;  %v3229_v8 = vld [vmem:[#allocation27_spill] sm:$0xff] }
 0x130   :  { %v592_v36 = vmax.f32 %v591_v61, 0.0  ;;  %664 = vmatmul.mubr.f32.vlgmr.msra.gmra.mxu0 %v591_v61  ;;  %735 = vmatmul.mubr.f32.vlgmr.msra.gmra.mxu1 %v591_v61  ;;  %v3230_v61 = vld [vmem:[#allocation28_spill] sm:$0xff] }
 0x131   :  { %772 = vmatpush1.msra.mxu0 %v2063_v12  ;;  %843 = vmatpush1.msra.mxu1 %v2065_v13 }
 0x132   :  { %593 = vst [vmem:[%s3067_s4] sm:$0xff] %v592_v36  ;;  %773 = vmatprep.subr.mxu0 %v2069_v14  ;;  %844 = vmatprep.subr.mxu1 %v2071_v15  ;;  %v3231_v36 = vmov 0.0  }
 0x133   :  { %774 = vmatpush1.msra.mxu0 %v2077_v16  ;;  %845 = vmatpush1.msra.mxu1 %v2079_v17 }
 0x134   :  { %775 = vmatprep.subr.mxu0 %v2088_v19  ;;  %846 = vmatprep.subr.mxu1 %v2090_v20 }
 0x135   :  { %776 = vmatpush1.msra.mxu0 %v2094_v21  ;;  %847 = vmatpush1.msra.mxu1 %v2096_v22 }
 0x136   :  { %777 = vmatprep.subr.mxu0 %v2100_v23  ;;  %848 = vmatprep.subr.mxu1 %v2102_v24 }
 0x137   :  { %778 = vmatpush1.msra.mxu0 %v2108_v25  ;;  %849 = vmatpush1.msra.mxu1 %v2110_v26 }
 0x138   :  { %779 = vmatprep.subr.mxu0 %v2119_v28  ;;  %850 = vmatprep.subr.mxu1 %v2121_v29 }
 0x139   :  { %780 = vmatpush1.msra.mxu0 %v2125_v30  ;;  %851 = vmatpush1.msra.mxu1 %v2127_v31 }
 0x13a   :  { %781 = vmatprep.subr.mxu0 %v2131_v32  ;;  %852 = vmatprep.subr.mxu1 %v2133_v33 }
 0x13b   :  { %782 = vmatpush1.msra.mxu0 %v2139_v34  ;;  %853 = vmatpush1.msra.mxu1 %v2141_v35 }
 0x13c   :  { %783 = vmatprep.subr.mxu0 %v2150_v37  ;;  %854 = vmatprep.subr.mxu1 %v2152_v38 }
 0x13d   :  { %784 = vmatpush1.msra.mxu0 %v2156_v39  ;;  %855 = vmatpush1.msra.mxu1 %v2158_v40 }
 0x13e   :  { %785 = vmatprep.subr.mxu0 %v2162_v41  ;;  %856 = vmatprep.subr.mxu1 %v2164_v42 }
 0x13f   :  { %786 = vmatpush1.msra.mxu0 %v2170_v43  ;;  %857 = vmatpush1.msra.mxu1 %v2172_v44 }
 0x140   :  { %787 = vmatprep.subr.mxu0 %v2181_v46  ;;  %858 = vmatprep.subr.mxu1 %v2183_v47 }
 0x141   :  { %788 = vmatpush1.msra.mxu0 %v2187_v48  ;;  %859 = vmatpush1.msra.mxu1 %v2189_v49 }
 0x142   :  { %789 = vmatprep.subr.mxu0 %v2193_v50  ;;  %860 = vmatprep.subr.mxu1 %v2195_v51 }
 0x143   :  { %790 = vmatpush1.msra.mxu0 %v2201_v52  ;;  %861 = vmatpush1.msra.mxu1 %v2203_v53 }
 0x144   :  { %791 = vmatprep.subr.mxu0 %v2212_v55  ;;  %862 = vmatprep.subr.mxu1 %v2214_v56 }
 0x145   :  { %792 = vmatpush1.msra.mxu0 %v2218_v57  ;;  %863 = vmatpush1.msra.mxu1 %v2220_v58 }
 0x146   :  { %793 = vmatprep.subr.mxu0 %v3212_v54  ;;  %864 = vmatprep.subr.mxu1 %v3213_v0 }
 0x147   :  { %794 = vmatpush1.msra.mxu0 %v3214_v10  ;;  %865 = vmatpush1.msra.mxu1 %v3215_v7 }
 0x148   :  { %795 = vmatprep.subr.mxu0 %v3216_v18  ;;  %866 = vmatprep.subr.mxu1 %v3217_v59 }
 0x149   :  { %796 = vmatpush1.msra.mxu0 %v3218_v5  ;;  %867 = vmatpush1.msra.mxu1 %v3219_v2 }
 0x14a   :  { %797 = vmatprep.subr.mxu0 %v3220_v60  ;;  %868 = vmatprep.subr.mxu1 %v3221_v63  ;;  %v3236_v60 = vld [vmem:[#allocation32_spill] sm:$0xff] }
 0x14b   :  { %798 = vmatpush1.msra.mxu0 %v3222_v1  ;;  %869 = vmatpush1.msra.mxu1 %v3223_v62  ;;  %v3233_v62 = vld [vmem:[#allocation8_spill] sm:$0xff] }
 0x14c   :  { %799 = vmatprep.subr.mxu0 %v3224_v11  ;;  %870 = vmatprep.subr.mxu1 %v3225_v3  ;;  %v3234_v11 = vld [vmem:[#allocation9_spill] sm:$0xff] }
 0x14d   :  { %800 = vmatpush1.msra.mxu0 %v3226_v27  ;;  %871 = vmatpush1.msra.mxu1 %v3227_v9  ;;  %v3235_v27 = vld [vmem:[#allocation30_spill] sm:$0xff] }
 0x14e   :  { %801 = vmatprep.subr.mxu0 %v3228_v4  ;;  %872 = vmatprep.subr.mxu1 %v3229_v8 }
 0x14f   :  { %802 = vmatpush1.msra.mxu0 %v3230_v61  ;;  %835 = vmatprep.mubr.f32.mxu0 %v3231_v36  ;;  %v3237_v61 = vld [vmem:[#allocation31_spill] sm:$0xff] }
 0x150   :  { %873 = vmatpush1.msra.mxu1 %v3232_v6  ;;  %906 = vmatprep.mubr.f32.mxu1 %v3231_v36  ;;  %v3238_v36 = vld [vmem:[#allocation33_spill] sm:$0xff] }
 0x151   :  { %943 = vmatprep.subr.mxu0 %v3233_v62  ;;  %1014 = vmatprep.subr.mxu1 %v3234_v11 }
 0x1f0   :  { %v665_v3 = vpop.f32.mrf.mxu0  ;;  %v736_v9 = vpop.f32.mrf.mxu1 }
 0x1f1   :  { %v741_v1 = vadd.f32 %v665_v3, %v3235_v27  ;;  %v743_v2 = vadd.f32 %v736_v9, %v3237_v61  ;;  %v3262_v61 = vld [vmem:[#allocation36_spill] sm:$0xff] }
 0x1f2   :  { %v667_v63 = vpop.f32.mrf.mxu0  ;;  %v738_v6 = vpop.f32.mrf.mxu1 }
 0x1f3   :  { %v745_v4 = vmul.f32 0.5, %v741_v1  ;;  %v742_v8 = vadd.f32 %v667_v63, %v3236_v60  ;;  %v744_v59 = vadd.f32 %v738_v6, %v3238_v36 }
 0x1f5   :  { %1842 = vtanh.f32 %v745_v4  ;;  %v749_v5 = vmul.f32 0.5, %v742_v8  ;;  %v754_v62 = vmul.f32 0.5, %v744_v59 }
 0x1f7   :  { %1844 = vtanh.f32 %v749_v5 }
 0x1f8   :  { %1846 = vtanh.f32 %v743_v2 }
 0x1f9   :  { %1848 = vtanh.f32 %v754_v62  ;;  %v3263_v62 = vld [vmem:[#allocation35_spill] sm:$0xff] }
 0x202   :  { %v1843_v18 = vpop.eup %1842 }
 0x203   :  { %v747_v11 = vmul.f32 0.5, %v1843_v18 }
 0x204   :  { %v1845_v7 = vpop.eup %1844 }
 0x205   :  { %v748_v10 = vadd.f32 0.5, %v747_v11  ;;  %v751_v3 = vmul.f32 0.5, %v1845_v7  ;;  %v1847_v27 = vpop.eup %1846 }
 0x206   :  { %v1849_v5 = vpop.eup %1848 }
 0x207   :  { %v752_v1 = vadd.f32 0.5, %v751_v3  ;;  %v759_v0 = vmul.f32 %v1847_v27, %v748_v10  ;;  %v756_v2 = vmul.f32 0.5, %v1849_v5 }
 0x209   :  { %v758_v60 = vmul.f32 %v752_v1, %v2465_v45  ;;  %v757_v9 = vadd.f32 0.5, %v756_v2  ;;  %v3264_v1 = vld [vmem:[#allocation37_spill] sm:$0xff] }
 0x20b   :  { %v2542_v63 = vadd.f32 %v759_v0, %v758_v60  ;;  %v3261_v0 = vld [vmem:[#allocation34_spill] sm:$0xff] }
 0x20d   :  { %1850 = vtanh.f32 %v2542_v63 }
 0x21a   :  { %v1851_v6 = vpop.eup %1850 }
 0x21b   :  { %v762_v59 = vmul.f32 %v1851_v6, %v757_v9 }
 0x21d   :  { %v763_v4 = vmax.f32 %v762_v59, 0.0  ;;  %836 = vmatmul.mubr.f32.vlgmr.msra.gmra.mxu0 %v762_v59  ;;  %907 = vmatmul.mubr.f32.vlgmr.msra.gmra.mxu1 %v762_v59 }
 0x21e   :  { %944 = vmatpush1.msra.mxu0 %v2063_v12  ;;  %1015 = vmatpush1.msra.mxu1 %v2065_v13  ;;  %v3239_v12 = vld [vmem:[#allocation11_spill] sm:$0xff]  ;;  %v3240_v13 = vld [vmem:[#allocation12_spill] sm:$0xff] }
 0x21f   :  { %1821 = vst [vmem:[%s3067_s4 + $0x8] sm:$0xff] %v763_v4  ;;  %945 = vmatprep.subr.mxu0 %v2069_v14  ;;  %1016 = vmatprep.subr.mxu1 %v2071_v15  ;;  %v3241_v14 = vld [vmem:[#allocation13_spill] sm:$0xff]  ;;  %v3242_v15 = vld [vmem:[#allocation14_spill] sm:$0xff] }
 0x220   :  { %946 = vmatpush1.msra.mxu0 %v2077_v16  ;;  %1017 = vmatpush1.msra.mxu1 %v2079_v17  ;;  %v3243_v16 = vld [vmem:[#allocation15_spill] sm:$0xff]  ;;  %v3244_v17 = vld [vmem:[#allocation16_spill] sm:$0xff] }
 0x221   :  { %947 = vmatprep.subr.mxu0 %v2088_v19  ;;  %1018 = vmatprep.subr.mxu1 %v2090_v20  ;;  %v3245_v19 = vld [vmem:[#allocation17_spill] sm:$0xff]  ;;  %v3246_v20 = vld [vmem:[#allocation18_spill] sm:$0xff] }
 0x222   :  { %948 = vmatpush1.msra.mxu0 %v2094_v21  ;;  %1019 = vmatpush1.msra.mxu1 %v2096_v22  ;;  %v3247_v21 = vld [vmem:[#allocation19_spill] sm:$0xff]  ;;  %v3248_v22 = vld [vmem:[#allocation20_spill] sm:$0xff] }
 0x223   :  { %949 = vmatprep.subr.mxu0 %v2100_v23  ;;  %1020 = vmatprep.subr.mxu1 %v2102_v24  ;;  %v3249_v23 = vld [vmem:[#allocation21_spill] sm:$0xff]  ;;  %v3250_v24 = vld [vmem:[#allocation22_spill] sm:$0xff] }
 0x224   :  { %950 = vmatpush1.msra.mxu0 %v2108_v25  ;;  %1021 = vmatpush1.msra.mxu1 %v2110_v26  ;;  %v3251_v25 = vld [vmem:[#allocation23_spill] sm:$0xff]  ;;  %v3252_v26 = vld [vmem:[#allocation24_spill] sm:$0xff] }
 0x225   :  { %951 = vmatprep.subr.mxu0 %v2119_v28  ;;  %1022 = vmatprep.subr.mxu1 %v2121_v29  ;;  %v3253_v28 = vld [vmem:[#allocation25_spill] sm:$0xff]  ;;  %v3254_v29 = vld [vmem:[#allocation26_spill] sm:$0xff] }
 0x226   :  { %952 = vmatpush1.msra.mxu0 %v2125_v30  ;;  %1023 = vmatpush1.msra.mxu1 %v2127_v31  ;;  %v3255_v30 = vld [vmem:[#allocation27_spill] sm:$0xff]  ;;  %v3256_v31 = vld [vmem:[#allocation28_spill] sm:$0xff] }
 0x227   :  { %953 = vmatprep.subr.mxu0 %v2131_v32  ;;  %1024 = vmatprep.subr.mxu1 %v2133_v33  ;;  %v3257_v32 = vmov 0.0   ;;  %v3258_v33 = vld [vmem:[#allocation29_spill] sm:$0xff] }
 0x228   :  { %954 = vmatpush1.msra.mxu0 %v2139_v34  ;;  %1025 = vmatpush1.msra.mxu1 %v2141_v35  ;;  %v2612_v34 = vld [vmem:[#allocation5 + $0x1e8] sm:$0xff]  ;;  %v2615_v35 = vld [vmem:[#allocation5 + $0x1f8] sm:$0xff] }
 0x229   :  { %955 = vmatprep.subr.mxu0 %v2150_v37  ;;  %1026 = vmatprep.subr.mxu1 %v2152_v38  ;;  %3259 = vst [vmem:[#allocation10_spill] sm:$0xff] %v2612_v34  ;;  %3260 = vst [vmem:[#allocation8_spill] sm:$0xff] %v2615_v35 }
 0x22a   :  { %956 = vmatpush1.msra.mxu0 %v2156_v39  ;;  %1027 = vmatpush1.msra.mxu1 %v2158_v40 }
 0x22b   :  { %957 = vmatprep.subr.mxu0 %v2162_v41  ;;  %1028 = vmatprep.subr.mxu1 %v2164_v42 }
 0x22c   :  { %958 = vmatpush1.msra.mxu0 %v2170_v43  ;;  %1029 = vmatpush1.msra.mxu1 %v2172_v44 }
 0x22d   :  { %959 = vmatprep.subr.mxu0 %v2181_v46  ;;  %1030 = vmatprep.subr.mxu1 %v2183_v47 }
 0x22e   :  { %960 = vmatpush1.msra.mxu0 %v2187_v48  ;;  %1031 = vmatpush1.msra.mxu1 %v2189_v49 }
 0x22f   :  { %961 = vmatprep.subr.mxu0 %v2193_v50  ;;  %1032 = vmatprep.subr.mxu1 %v2195_v51 }
 0x230   :  { %962 = vmatpush1.msra.mxu0 %v2201_v52  ;;  %1033 = vmatpush1.msra.mxu1 %v2203_v53 }
 0x231   :  { %963 = vmatprep.subr.mxu0 %v2212_v55  ;;  %1034 = vmatprep.subr.mxu1 %v2214_v56 }
 0x232   :  { %964 = vmatpush1.msra.mxu0 %v2218_v57  ;;  %1035 = vmatpush1.msra.mxu1 %v2220_v58 }
 0x233   :  { %965 = vmatprep.subr.mxu0 %v3212_v54  ;;  %1036 = vmatprep.subr.mxu1 %v3239_v12 }
 0x234   :  { %966 = vmatpush1.msra.mxu0 %v3240_v13  ;;  %1037 = vmatpush1.msra.mxu1 %v3241_v14 }
 0x235   :  { %967 = vmatprep.subr.mxu0 %v3242_v15  ;;  %1038 = vmatprep.subr.mxu1 %v3243_v16 }
 0x236   :  { %968 = vmatpush1.msra.mxu0 %v3244_v17  ;;  %1039 = vmatpush1.msra.mxu1 %v3245_v19 }
 0x237   :  { %969 = vmatprep.subr.mxu0 %v3246_v20  ;;  %1040 = vmatprep.subr.mxu1 %v3247_v21 }
 0x238   :  { %970 = vmatpush1.msra.mxu0 %v3248_v22  ;;  %1041 = vmatpush1.msra.mxu1 %v3249_v23 }
 0x239   :  { %971 = vmatprep.subr.mxu0 %v3250_v24  ;;  %1042 = vmatprep.subr.mxu1 %v3251_v25 }
 0x23a   :  { %972 = vmatpush1.msra.mxu0 %v3252_v26  ;;  %1043 = vmatpush1.msra.mxu1 %v3253_v28 }
 0x23b   :  { %973 = vmatprep.subr.mxu0 %v3254_v29  ;;  %1044 = vmatprep.subr.mxu1 %v3255_v30 }
 0x23c   :  { %974 = vmatpush1.msra.mxu0 %v3256_v31  ;;  %1007 = vmatprep.mubr.f32.mxu0 %v3257_v32 }
 0x23d   :  { %1045 = vmatpush1.msra.mxu1 %v3258_v33  ;;  %1078 = vmatprep.mubr.f32.mxu1 %v3257_v32 }
 0x23e   :  { %1115 = vmatprep.subr.mxu0 %v2612_v34  ;;  %1186 = vmatprep.subr.mxu1 %v2615_v35 }
 0x2dd   :  { %v837_v45 = vpop.f32.mrf.mxu0  ;;  %v908_v7 = vpop.f32.mrf.mxu1 }
 0x2de   :  { %v913_v10 = vadd.f32 %v837_v45, %v3261_v0  ;;  %v915_v11 = vadd.f32 %v908_v7, %v3263_v62 }
 0x2df   :  { %v839_v18 = vpop.f32.mrf.mxu0  ;;  %v910_v27 = vpop.f32.mrf.mxu1 }
 0x2e0   :  { %v917_v8 = vmul.f32 0.5, %v913_v10  ;;  %v914_v36 = vadd.f32 %v839_v18, %v3262_v61  ;;  %v916_v60 = vadd.f32 %v910_v27, %v3264_v1  ;;  %v2626_v27 = vld [vmem:[#allocation5 + $0x1e0] sm:$0xff]  ;;  %v2629_v1 = vld [vmem:[#allocation5 + $0x1f0] sm:$0xff] }
 0x2e2   :  { %1852 = vtanh.f32 %v917_v8  ;;  %v921_v3 = vmul.f32 0.5, %v914_v36  ;;  %v926_v5 = vmul.f32 0.5, %v916_v60  ;;  %v2638_v60 = vld [vmem:[#allocation5 + $0x1d8] sm:$0xff] }
 0x2e4   :  { %1854 = vtanh.f32 %v921_v3 }
 0x2e5   :  { %1856 = vtanh.f32 %v915_v11 }
 0x2e6   :  { %1858 = vtanh.f32 %v926_v5  ;;  %v2641_v5 = vld [vmem:[#allocation5 + $0x1c0] sm:$0xff] }
 0x2ef   :  { %v1853_v2 = vpop.eup %1852 }
 0x2f0   :  { %v919_v9 = vmul.f32 0.5, %v1853_v2  ;;  %v2644_v2 = vld [vmem:[#allocation5 + $0x1d0] sm:$0xff] }
 0x2f1   :  { %v1855_v6 = vpop.eup %1854 }
 0x2f2   :  { %v920_v59 = vadd.f32 0.5, %v919_v9  ;;  %v923_v4 = vmul.f32 0.5, %v1855_v6  ;;  %v1857_v45 = vpop.eup %1856  ;;  %v2647_v9 = vld [vmem:[#allocation5 + $0x1a8] sm:$0xff]  ;;  %v2650_v6 = vld [vmem:[#allocation5 + $0x1b8] sm:$0xff] }
 0x2f3   :  { %v1859_v7 = vpop.eup %1858 }
 0x2f4   :  { %v924_v0 = vadd.f32 0.5, %v923_v4  ;;  %v931_v10 = vmul.f32 %v1857_v45, %v920_v59  ;;  %v928_v61 = vmul.f32 0.5, %v1859_v7  ;;  %v2653_v59 = vld [vmem:[#allocation5 + $0x1a0] sm:$0xff]  ;;  %v2656_v4 = vld [vmem:[#allocation5 + $0x1b0] sm:$0xff]  ;;  %v2659_v45 = vld [vmem:[#allocation5 + $0x188] sm:$0xff] }
 0x2f5   :  { %v2671_v7 = vld [vmem:[#allocation5 + $0x168] sm:$0xff] }
 0x2f6   :  { %v930_v18 = vmul.f32 %v924_v0, %v2542_v63  ;;  %v929_v36 = vadd.f32 0.5, %v928_v61  ;;  %v2635_v63 = vld [vmem:[#allocation5 + $0x1c8] sm:$0xff]  ;;  %v2662_v0 = vld [vmem:[#allocation5 + $0x198] sm:$0xff]  ;;  %3265 = vst [vmem:[#allocation9_spill] sm:$0xff] %v2671_v7 }
 0x2f7   :  { %v2674_v61 = vld [vmem:[#allocation5 + $0x178] sm:$0xff] }
 0x2f8   :  { %v2623_v8 = vadd.f32 %v931_v10, %v930_v18  ;;  %v2665_v10 = vld [vmem:[#allocation5 + $0x180] sm:$0xff]  ;;  %v2668_v18 = vld [vmem:[#allocation5 + $0x190] sm:$0xff]  ;;  %3266 = vst [vmem:[#allocation30_spill] sm:$0xff] %v2674_v61 }
 0x2fa   :  { %1860 = vtanh.f32 %v2623_v8 }
 0x307   :  { %v1861_v62 = vpop.eup %1860 }
 0x308   :  { %v934_v11 = vmul.f32 %v1861_v62, %v929_v36  ;;  %v2677_v36 = vld [vmem:[#allocation5 + $0x160] sm:$0xff]  ;;  %v2680_v62 = vld [vmem:[#allocation5 + $0x170] sm:$0xff] }
 0x30a   :  { %v935_v3 = vmax.f32 %v934_v11, 0.0  ;;  %1008 = vmatmul.mubr.f32.vlgmr.msra.gmra.mxu0 %v934_v11  ;;  %1079 = vmatmul.mubr.f32.vlgmr.msra.gmra.mxu1 %v934_v11  ;;  %v2683_v11 = vld [vmem:[#allocation5 + $0x148] sm:$0xff] }
 0x30b   :  { %1116 = vmatpush1.msra.mxu0 %v2626_v27  ;;  %1187 = vmatpush1.msra.mxu1 %v2629_v1 }
 0x30c   :  { %1822 = vst [vmem:[%s3067_s4 + $0x10] sm:$0xff] %v935_v3  ;;  %1117 = vmatprep.subr.mxu0 %v2635_v63  ;;  %1188 = vmatprep.subr.mxu1 %v2638_v60  ;;  %v2686_v3 = vld [vmem:[#allocation5 + $0x158] sm:$0xff] }
 0x30d   :  { %1118 = vmatpush1.msra.mxu0 %v2641_v5  ;;  %1189 = vmatpush1.msra.mxu1 %v2644_v2 }
 0x30e   :  { %1119 = vmatprep.subr.mxu0 %v2647_v9  ;;  %1190 = vmatprep.subr.mxu1 %v2650_v6 }
 0x30f   :  { %1120 = vmatpush1.msra.mxu0 %v2653_v59  ;;  %1191 = vmatpush1.msra.mxu1 %v2656_v4 }
 0x310   :  { %1121 = vmatprep.subr.mxu0 %v2659_v45  ;;  %1192 = vmatprep.subr.mxu1 %v2662_v0 }
 0x311   :  { %1122 = vmatpush1.msra.mxu0 %v2665_v10  ;;  %1193 = vmatpush1.msra.mxu1 %v2668_v18 }
 0x312   :  { %1123 = vmatprep.subr.mxu0 %v2671_v7  ;;  %1194 = vmatprep.subr.mxu1 %v2674_v61  ;;  %v2689_v7 = vld [vmem:[#allocation5 + $0x140] sm:$0xff]  ;;  %v2692_v61 = vld [vmem:[#allocation5 + $0x150] sm:$0xff] }
 0x313   :  { %1124 = vmatpush1.msra.mxu0 %v2677_v36  ;;  %1195 = vmatpush1.msra.mxu1 %v2680_v62 }
 0x314   :  { %1125 = vmatprep.subr.mxu0 %v2683_v11  ;;  %1196 = vmatprep.subr.mxu1 %v2686_v3 }
 0x315   :  { %1126 = vmatpush1.msra.mxu0 %v2689_v7  ;;  %1197 = vmatpush1.msra.mxu1 %v2692_v61 }
 0x316   :  { %1127 = vmatprep.subr.mxu0 %v2150_v37  ;;  %1198 = vmatprep.subr.mxu1 %v2152_v38  ;;  %v3267_v38 = vld [vmem:[#allocation38_spill] sm:$0xff] }
 0x317   :  { %1128 = vmatpush1.msra.mxu0 %v2156_v39  ;;  %1199 = vmatpush1.msra.mxu1 %v2158_v40 }
 0x318   :  { %1129 = vmatprep.subr.mxu0 %v2162_v41  ;;  %1200 = vmatprep.subr.mxu1 %v2164_v42 }
 0x319   :  { %1130 = vmatpush1.msra.mxu0 %v2170_v43  ;;  %1201 = vmatpush1.msra.mxu1 %v2172_v44  ;;  %v3268_v43 = vld [vmem:[#allocation40_spill] sm:$0xff] }
 0x31a   :  { %1131 = vmatprep.subr.mxu0 %v2181_v46  ;;  %1202 = vmatprep.subr.mxu1 %v2183_v47  ;;  %v3269_v46 = vld [vmem:[#allocation39_spill] sm:$0xff] }
 0x31b   :  { %1132 = vmatpush1.msra.mxu0 %v2187_v48  ;;  %1203 = vmatpush1.msra.mxu1 %v2189_v49 }
 0x31c   :  { %1133 = vmatprep.subr.mxu0 %v2193_v50  ;;  %1204 = vmatprep.subr.mxu1 %v2195_v51  ;;  %v3270_v50 = vld [vmem:[#allocation41_spill] sm:$0xff] }
 0x31d   :  { %1134 = vmatpush1.msra.mxu0 %v2201_v52  ;;  %1205 = vmatpush1.msra.mxu1 %v2203_v53 }
 0x31e   :  { %1135 = vmatprep.subr.mxu0 %v2212_v55  ;;  %1206 = vmatprep.subr.mxu1 %v2214_v56 }
 0x31f   :  { %1136 = vmatpush1.msra.mxu0 %v2218_v57  ;;  %1207 = vmatpush1.msra.mxu1 %v2220_v58 }
 0x320   :  { %1137 = vmatprep.subr.mxu0 %v3212_v54  ;;  %1208 = vmatprep.subr.mxu1 %v3239_v12 }
 0x321   :  { %1138 = vmatpush1.msra.mxu0 %v3240_v13  ;;  %1209 = vmatpush1.msra.mxu1 %v3241_v14 }
 0x322   :  { %1139 = vmatprep.subr.mxu0 %v3242_v15  ;;  %1210 = vmatprep.subr.mxu1 %v3243_v16 }
 0x323   :  { %1140 = vmatpush1.msra.mxu0 %v3244_v17  ;;  %1211 = vmatpush1.msra.mxu1 %v3245_v19 }
 0x324   :  { %1141 = vmatprep.subr.mxu0 %v3246_v20  ;;  %1212 = vmatprep.subr.mxu1 %v3247_v21 }
 0x325   :  { %1142 = vmatpush1.msra.mxu0 %v3248_v22  ;;  %1213 = vmatpush1.msra.mxu1 %v3249_v23  ;;  %v3271_v23 = vld [vmem:[#allocation9_spill] sm:$0xff] }
 0x326   :  { %1143 = vmatprep.subr.mxu0 %v3250_v24  ;;  %1214 = vmatprep.subr.mxu1 %v3251_v25  ;;  %v3272_v24 = vld [vmem:[#allocation30_spill] sm:$0xff]  ;;  %v2772_v25 = vld [vmem:[#allocation5 + $0x128] sm:$0xff] }
 0x327   :  { %1144 = vmatpush1.msra.mxu0 %v3252_v26  ;;  %1215 = vmatpush1.msra.mxu1 %v3253_v28  ;;  %v2775_v26 = vld [vmem:[#allocation5 + $0x138] sm:$0xff]  ;;  %v2778_v28 = vld [vmem:[#allocation5 + $0x120] sm:$0xff] }
 0x328   :  { %1145 = vmatprep.subr.mxu0 %v3254_v29  ;;  %1216 = vmatprep.subr.mxu1 %v3255_v30  ;;  %v2781_v29 = vld [vmem:[#allocation5 + $0x130] sm:$0xff]  ;;  %v2784_v30 = vld [vmem:[#allocation5 + $0x108] sm:$0xff] }
 0x329   :  { %1146 = vmatpush1.msra.mxu0 %v3256_v31  ;;  %1179 = vmatprep.mubr.f32.mxu0 %v3257_v32  ;;  %v2787_v31 = vld [vmem:[#allocation5 + $0x118] sm:$0xff] }
 0x32a   :  { %1217 = vmatpush1.msra.mxu1 %v3258_v33  ;;  %1250 = vmatprep.mubr.f32.mxu1 %v3257_v32  ;;  %v2790_v33 = vld [vmem:[#allocation5 + $0x100] sm:$0xff] }
 0x32b   :  { %1287 = vmatprep.subr.mxu0 %v2612_v34  ;;  %1358 = vmatprep.subr.mxu1 %v2615_v35 }
 0x3ca   :  { %v1009_v37 = vpop.f32.mrf.mxu0  ;;  %v1080_v40 = vpop.f32.mrf.mxu1 }
 0x3cb   :  { %v1085_v39 = vadd.f32 %v1009_v37, %v3267_v38  ;;  %v1087_v47 = vadd.f32 %v1080_v40, %v3269_v46  ;;  %v2796_v37 = vld [vmem:[#allocation5 + $0xe8] sm:$0xff]  ;;  %v2799_v38 = vld [vmem:[#allocation5 + $0xf8] sm:$0xff]  ;;  %v2805_v40 = vld [vmem:[#allocation5 + $0xf0] sm:$0xff] }
 0x3cc   :  { %v1011_v41 = vpop.f32.mrf.mxu0  ;;  %v1082_v49 = vpop.f32.mrf.mxu1  ;;  %v2820_v46 = vld [vmem:[#allocation5 + $0xa8] sm:$0xff] }
 0x3cd   :  { %v1089_v42 = vmul.f32 0.5, %v1085_v39  ;;  %v1086_v44 = vadd.f32 %v1011_v41, %v3268_v43  ;;  %v1088_v51 = vadd.f32 %v1082_v49, %v3270_v50  ;;  %v2802_v39 = vld [vmem:[#allocation5 + $0xe0] sm:$0xff]  ;;  %v2808_v41 = vld [vmem:[#allocation5 + $0xc8] sm:$0xff]  ;;  %v2829_v49 = vld [vmem:[#allocation5 + $0xb0] sm:$0xff] }
 0x3ce   :  { %v2814_v43 = vld [vmem:[#allocation5 + $0xc0] sm:$0xff]  ;;  %v2832_v50 = vld [vmem:[#allocation5 + $0x88] sm:$0xff] }
 0x3cf   :  { %1862 = vtanh.f32 %v1089_v42  ;;  %v1093_v48 = vmul.f32 0.5, %v1086_v44  ;;  %v1098_v52 = vmul.f32 0.5, %v1088_v51  ;;  %v2811_v42 = vld [vmem:[#allocation5 + $0xd8] sm:$0xff]  ;;  %v2817_v44 = vld [vmem:[#allocation5 + $0xd0] sm:$0xff] }
 0x3d0   :  { %v2835_v51 = vld [vmem:[#allocation5 + $0x98] sm:$0xff] }
 0x3d1   :  { %1864 = vtanh.f32 %v1093_v48  ;;  %v2826_v48 = vld [vmem:[#allocation5 + $0xa0] sm:$0xff]  ;;  %3273 = vst [vmem:[#allocation32_spill] sm:$0xff] %v2835_v51 }
 0x3d2   :  { %1866 = vtanh.f32 %v1087_v47  ;;  %v2823_v47 = vld [vmem:[#allocation5 + $0xb8] sm:$0xff] }
 0x3d3   :  { %1868 = vtanh.f32 %v1098_v52  ;;  %v2838_v52 = vld [vmem:[#allocation5 + $0x80] sm:$0xff] }
 0x3d4   :  { %3274 = vst [vmem:[#allocation31_spill] sm:$0xff] %v2838_v52 }
 0x3dc   :  { %v1863_v53 = vpop.eup %1862 }
 0x3dd   :  { %v1091_v55 = vmul.f32 0.5, %v1863_v53  ;;  %v2841_v53 = vld [vmem:[#allocation5 + $0x90] sm:$0xff] }
 0x3de   :  { %v1865_v56 = vpop.eup %1864  ;;  %3275 = vst [vmem:[#allocation33_spill] sm:$0xff] %v2841_v53 }
 0x3df   :  { %v1092_v57 = vadd.f32 0.5, %v1091_v55  ;;  %v1095_v58 = vmul.f32 0.5, %v1865_v56  ;;  %v1867_v54 = vpop.eup %1866  ;;  %v2844_v55 = vld [vmem:[#allocation5 + $0x68] sm:$0xff]  ;;  %v2847_v56 = vld [vmem:[#allocation5 + $0x78] sm:$0xff] }
 0x3e0   :  { %v1869_v16 = vpop.eup %1868  ;;  %3276 = vst [vmem:[#allocation11_spill] sm:$0xff] %v2844_v55  ;;  %3277 = vst [vmem:[#allocation12_spill] sm:$0xff] %v2847_v56 }
 0x3e1   :  { %v1096_v12 = vadd.f32 0.5, %v1095_v58  ;;  %v1103_v13 = vmul.f32 %v1867_v54, %v1092_v57  ;;  %v1100_v17 = vmul.f32 0.5, %v1869_v16  ;;  %v2850_v57 = vld [vmem:[#allocation5 + $0x60] sm:$0xff]  ;;  %v2853_v58 = vld [vmem:[#allocation5 + $0x70] sm:$0xff]  ;;  %v2856_v54 = vld [vmem:[#allocation5 + $0x48] sm:$0xff] }
 0x3e2   :  { %3278 = vst [vmem:[#allocation13_spill] sm:$0xff] %v2850_v57  ;;  %3279 = vst [vmem:[#allocation14_spill] sm:$0xff] %v2853_v58  ;;  %v2868_v16 = vld [vmem:[#allocation5 + $0x28] sm:$0xff] }
 0x3e3   :  { %v1102_v14 = vmul.f32 %v1096_v12, %v2623_v8  ;;  %v1101_v19 = vadd.f32 0.5, %v1100_v17  ;;  %v2793_v8 = vld [vmem:[#allocation5 + $0x110] sm:$0xff]  ;;  %3280 = vst [vmem:[#allocation15_spill] sm:$0xff] %v2856_v54  ;;  %v2859_v12 = vld [vmem:[#allocation5 + $0x58] sm:$0xff]  ;;  %3284 = vst [vmem:[#allocation19_spill] sm:$0xff] %v2868_v16 }
 0x3e4   :  { %3281 = vst [vmem:[#allocation16_spill] sm:$0xff] %v2859_v12  ;;  %v2871_v17 = vld [vmem:[#allocation5 + $0x38] sm:$0xff] }
 0x3e5   :  { %v2744_v15 = vadd.f32 %v1103_v13, %v1102_v14  ;;  %v2862_v13 = vld [vmem:[#allocation5 + $0x40] sm:$0xff]  ;;  %v2865_v14 = vld [vmem:[#allocation5 + $0x50] sm:$0xff]  ;;  %3285 = vst [vmem:[#allocation20_spill] sm:$0xff] %v2871_v17 }
 0x3e6   :  { %3282 = vst [vmem:[#allocation17_spill] sm:$0xff] %v2862_v13  ;;  %3283 = vst [vmem:[#allocation18_spill] sm:$0xff] %v2865_v14 }
 0x3e7   :  { %1870 = vtanh.f32 %v2744_v15 }
 0x3f4   :  { %v1871_v20 = vpop.eup %1870 }
 0x3f5   :  { %v1106_v21 = vmul.f32 %v1871_v20, %v1101_v19  ;;  %v2874_v19 = vld [vmem:[#allocation5 + $0x20] sm:$0xff]  ;;  %v2877_v20 = vld [vmem:[#allocation5 + $0x30] sm:$0xff] }
 0x3f6   :  { %3286 = vst [vmem:[#allocation21_spill] sm:$0xff] %v2874_v19  ;;  %3287 = vst [vmem:[#allocation22_spill] sm:$0xff] %v2877_v20 }
 0x3f7   :  { %v1107_v22 = vmax.f32 %v1106_v21, 0.0  ;;  %1180 = vmatmul.mubr.f32.vlgmr.msra.gmra.mxu0 %v1106_v21  ;;  %1251 = vmatmul.mubr.f32.vlgmr.msra.gmra.mxu1 %v1106_v21  ;;  %v2880_v21 = vld [vmem:[#allocation5 + $0x8] sm:$0xff] }
 0x3f8   :  { %1288 = vmatpush1.msra.mxu0 %v2626_v27  ;;  %1359 = vmatpush1.msra.mxu1 %v2629_v1  ;;  %3288 = vst [vmem:[#allocation23_spill] sm:$0xff] %v2880_v21 }
 0x3f9   :  { %1823 = vst [vmem:[%s3067_s4 + $0x18] sm:$0xff] %v1107_v22  ;;  %1289 = vmatprep.subr.mxu0 %v2635_v63  ;;  %1360 = vmatprep.subr.mxu1 %v2638_v60  ;;  %v2883_v22 = vld [vmem:[#allocation5 + $0x18] sm:$0xff] }
 0x3fa   :  { %1290 = vmatpush1.msra.mxu0 %v2641_v5  ;;  %1361 = vmatpush1.msra.mxu1 %v2644_v2  ;;  %3289 = vst [vmem:[#allocation24_spill] sm:$0xff] %v2883_v22 }
 0x3fb   :  { %1291 = vmatprep.subr.mxu0 %v2647_v9  ;;  %1362 = vmatprep.subr.mxu1 %v2650_v6 }
 0x3fc   :  { %1292 = vmatpush1.msra.mxu0 %v2653_v59  ;;  %1363 = vmatpush1.msra.mxu1 %v2656_v4 }
 0x3fd   :  { %1293 = vmatprep.subr.mxu0 %v2659_v45  ;;  %1364 = vmatprep.subr.mxu1 %v2662_v0 }
 0x3fe   :  { %1294 = vmatpush1.msra.mxu0 %v2665_v10  ;;  %1365 = vmatpush1.msra.mxu1 %v2668_v18 }
 0x3ff   :  { %1295 = vmatprep.subr.mxu0 %v3271_v23  ;;  %1366 = vmatprep.subr.mxu1 %v3272_v24 }
 0x400   :  { %1296 = vmatpush1.msra.mxu0 %v2677_v36  ;;  %1367 = vmatpush1.msra.mxu1 %v2680_v62 }
 0x401   :  { %1297 = vmatprep.subr.mxu0 %v2683_v11  ;;  %1368 = vmatprep.subr.mxu1 %v2686_v3 }
 0x402   :  { %1298 = vmatpush1.msra.mxu0 %v2689_v7  ;;  %1369 = vmatpush1.msra.mxu1 %v2692_v61 }
 0x403   :  { %1299 = vmatprep.subr.mxu0 %v2772_v25  ;;  %1370 = vmatprep.subr.mxu1 %v2775_v26 }
 0x404   :  { %1300 = vmatpush1.msra.mxu0 %v2778_v28  ;;  %1371 = vmatpush1.msra.mxu1 %v2781_v29 }
 0x405   :  { %1301 = vmatprep.subr.mxu0 %v2784_v30  ;;  %1372 = vmatprep.subr.mxu1 %v2787_v31 }
 0x406   :  { %1302 = vmatpush1.msra.mxu0 %v2790_v33  ;;  %1373 = vmatpush1.msra.mxu1 %v2793_v8 }
 0x407   :  { %1303 = vmatprep.subr.mxu0 %v2796_v37  ;;  %1374 = vmatprep.subr.mxu1 %v2799_v38 }
 0x408   :  { %1304 = vmatpush1.msra.mxu0 %v2802_v39  ;;  %1375 = vmatpush1.msra.mxu1 %v2805_v40 }
 0x409   :  { %1305 = vmatprep.subr.mxu0 %v2808_v41  ;;  %1376 = vmatprep.subr.mxu1 %v2811_v42 }
 0x40a   :  { %1306 = vmatpush1.msra.mxu0 %v2814_v43  ;;  %1377 = vmatpush1.msra.mxu1 %v2817_v44 }
 0x40b   :  { %1307 = vmatprep.subr.mxu0 %v2820_v46  ;;  %1378 = vmatprep.subr.mxu1 %v2823_v47 }
 0x40c   :  { %1308 = vmatpush1.msra.mxu0 %v2826_v48  ;;  %1379 = vmatpush1.msra.mxu1 %v2829_v49 }
 0x40d   :  { %1309 = vmatprep.subr.mxu0 %v2832_v50  ;;  %1380 = vmatprep.subr.mxu1 %v2835_v51 }
 0x40e   :  { %1310 = vmatpush1.msra.mxu0 %v2838_v52  ;;  %1381 = vmatpush1.msra.mxu1 %v2841_v53 }
 0x40f   :  { %1311 = vmatprep.subr.mxu0 %v2844_v55  ;;  %1382 = vmatprep.subr.mxu1 %v2847_v56 }
 0x410   :  { %1312 = vmatpush1.msra.mxu0 %v2850_v57  ;;  %1383 = vmatpush1.msra.mxu1 %v2853_v58 }
 0x411   :  { %1313 = vmatprep.subr.mxu0 %v2856_v54  ;;  %1384 = vmatprep.subr.mxu1 %v2859_v12  ;;  %v3293_v12 = vld [vmem:[#allocation44_spill] sm:$0xff]  ;;  %v3294_v54 = vld [vmem:[#allocation43_spill] sm:$0xff] }
 0x412   :  { %1314 = vmatpush1.msra.mxu0 %v2862_v13  ;;  %1385 = vmatpush1.msra.mxu1 %v2865_v14 }
 0x413   :  { %1315 = vmatprep.subr.mxu0 %v2868_v16  ;;  %1386 = vmatprep.subr.mxu1 %v2871_v17  ;;  %v2886_v16 = vld [vmem:[#allocation5] sm:$0xff]  ;;  %v2890_v17 = vld [vmem:[#allocation5 + $0x10] sm:$0xff] }
 0x414   :  { %1316 = vmatpush1.msra.mxu0 %v2874_v19  ;;  %1387 = vmatpush1.msra.mxu1 %v2877_v20  ;;  %3290 = vst [vmem:[#allocation25_spill] sm:$0xff] %v2886_v16  ;;  %3291 = vst [vmem:[#allocation26_spill] sm:$0xff] %v2890_v17  ;;  %v3292_v20 = vld [vmem:[#allocation42_spill] sm:$0xff] }
 0x415   :  { %1317 = vmatprep.subr.mxu0 %v2880_v21  ;;  %1388 = vmatprep.subr.mxu1 %v2883_v22 }
 0x416   :  { %1318 = vmatpush1.msra.mxu0 %v2886_v16  ;;  %1351 = vmatprep.mubr.f32.mxu0 %v3257_v32 }
 0x417   :  { %1389 = vmatpush1.msra.mxu1 %v2890_v17  ;;  %1422 = vmatprep.mubr.f32.mxu1 %v3257_v32  ;;  %v3295_v32 = vld [vmem:[#allocation45_spill] sm:$0xff] }
 0x418   :  { %1459 = vmatprep.subr.mxu0 %v2612_v34  ;;  %1530 = vmatprep.subr.mxu1 %v2615_v35 }
 0x4b7   :  { %v1181_v21 = vpop.f32.mrf.mxu0  ;;  %v1252_v22 = vpop.f32.mrf.mxu1 }
 0x4b8   :  { %v1257_v19 = vadd.f32 %v1181_v21, %v3292_v20  ;;  %v1259_v58 = vadd.f32 %v1252_v22, %v3294_v54  ;;  %v3305_v22 = vld [vmem:[#allocation17_spill] sm:$0xff] }
 0x4b9   :  { %v1183_v14 = vpop.f32.mrf.mxu0  ;;  %v1254_v17 = vpop.f32.mrf.mxu1 }
 0x4ba   :  { %v1261_v13 = vmul.f32 0.5, %v1257_v19  ;;  %v1258_v16 = vadd.f32 %v1183_v14, %v3293_v12  ;;  %v1260_v56 = vadd.f32 %v1254_v17, %v3295_v32  ;;  %v3304_v17 = vld [vmem:[#allocation16_spill] sm:$0xff] }
 0x4bc   :  { %1872 = vtanh.f32 %v1261_v13  ;;  %v1265_v57 = vmul.f32 0.5, %v1258_v16  ;;  %v1270_v34 = vmul.f32 0.5, %v1260_v56  ;;  %v3303_v16 = vld [vmem:[#allocation15_spill] sm:$0xff] }
 0x4be   :  { %1874 = vtanh.f32 %v1265_v57 }
 0x4bf   :  { %1876 = vtanh.f32 %v1259_v58 }
 0x4c0   :  { %1878 = vtanh.f32 %v1270_v34  ;;  %v3296_v34 = vld [vmem:[#allocation32_spill] sm:$0xff] }
 0x4c9   :  { %v1873_v55 = vpop.eup %1872 }
 0x4ca   :  { %v1263_v35 = vmul.f32 0.5, %v1873_v55  ;;  %v3302_v55 = vld [vmem:[#allocation14_spill] sm:$0xff] }
 0x4cb   :  { %v1875_v53 = vpop.eup %1874 }
 0x4cc   :  { %v1264_v52 = vadd.f32 0.5, %v1263_v35  ;;  %v1267_v20 = vmul.f32 0.5, %v1875_v53  ;;  %v1877_v21 = vpop.eup %1876  ;;  %v3297_v35 = vld [vmem:[#allocation31_spill] sm:$0xff]  ;;  %v3301_v53 = vld [vmem:[#allocation13_spill] sm:$0xff] }
 0x4cd   :  { %v1879_v57 = vpop.eup %1878 }
 0x4ce   :  { %v1268_v19 = vadd.f32 0.5, %v1267_v20  ;;  %v1275_v51 = vmul.f32 %v1877_v21, %v1264_v52  ;;  %v1272_v58 = vmul.f32 0.5, %v1879_v57  ;;  %v3300_v52 = vld [vmem:[#allocation12_spill] sm:$0xff]  ;;  %v3306_v20 = vld [vmem:[#allocation18_spill] sm:$0xff]  ;;  %v3307_v21 = vld [vmem:[#allocation19_spill] sm:$0xff] }
 0x4cf   :  { %v3310_v57 = vld [vmem:[#allocation22_spill] sm:$0xff] }
 0x4d0   :  { %v1274_v12 = vmul.f32 %v1268_v19, %v2744_v15  ;;  %v1273_v54 = vadd.f32 0.5, %v1272_v58  ;;  %v3298_v15 = vld [vmem:[#allocation33_spill] sm:$0xff]  ;;  %v3308_v19 = vld [vmem:[#allocation20_spill] sm:$0xff]  ;;  %v3311_v58 = vld [vmem:[#allocation23_spill] sm:$0xff] }
 0x4d2   :  { %v2901_v13 = vadd.f32 %v1275_v51, %v1274_v12  ;;  %v3299_v51 = vld [vmem:[#allocation11_spill] sm:$0xff]  ;;  %v3309_v12 = vld [vmem:[#allocation21_spill] sm:$0xff] }
 0x4d4   :  { %1880 = vtanh.f32 %v2901_v13 }
 0x4e1   :  { %v1881_v32 = vpop.eup %1880 }
 0x4e2   :  { %v1278_v56 = vmul.f32 %v1881_v32, %v1273_v54  ;;  %v3312_v54 = vld [vmem:[#allocation24_spill] sm:$0xff]  ;;  %v3313_v32 = vld [vmem:[#allocation25_spill] sm:$0xff] }
 0x4e4   :  { %v1279_v14 = vmax.f32 %v1278_v56, 0.0  ;;  %1352 = vmatmul.mubr.f32.vlgmr.msra.gmra.mxu0 %v1278_v56  ;;  %1423 = vmatmul.mubr.f32.vlgmr.msra.gmra.mxu1 %v1278_v56  ;;  %v3314_v56 = vmov 0.0  }
 0x4e5   :  { %1460 = vmatpush1.msra.mxu0 %v2626_v27  ;;  %1531 = vmatpush1.msra.mxu1 %v2629_v1 }
 0x4e6   :  { %1824 = vst [vmem:[%s3067_s4 + $0x20] sm:$0xff] %v1279_v14  ;;  %1461 = vmatprep.subr.mxu0 %v2635_v63  ;;  %1532 = vmatprep.subr.mxu1 %v2638_v60  ;;  %v3315_v14 = vld [vmem:[#allocation26_spill] sm:$0xff] }
 0x4e7   :  { %1462 = vmatpush1.msra.mxu0 %v2641_v5  ;;  %1533 = vmatpush1.msra.mxu1 %v2644_v2 }
 0x4e8   :  { %1463 = vmatprep.subr.mxu0 %v2647_v9  ;;  %1534 = vmatprep.subr.mxu1 %v2650_v6 }
 0x4e9   :  { %1464 = vmatpush1.msra.mxu0 %v2653_v59  ;;  %1535 = vmatpush1.msra.mxu1 %v2656_v4 }
 0x4ea   :  { %1465 = vmatprep.subr.mxu0 %v2659_v45  ;;  %1536 = vmatprep.subr.mxu1 %v2662_v0 }
 0x4eb   :  { %1466 = vmatpush1.msra.mxu0 %v2665_v10  ;;  %1537 = vmatpush1.msra.mxu1 %v2668_v18 }
 0x4ec   :  { %1467 = vmatprep.subr.mxu0 %v3271_v23  ;;  %1538 = vmatprep.subr.mxu1 %v3272_v24 }
 0x4ed   :  { %1468 = vmatpush1.msra.mxu0 %v2677_v36  ;;  %1539 = vmatpush1.msra.mxu1 %v2680_v62 }
 0x4ee   :  { %1469 = vmatprep.subr.mxu0 %v2683_v11  ;;  %1540 = vmatprep.subr.mxu1 %v2686_v3 }
 0x4ef   :  { %1470 = vmatpush1.msra.mxu0 %v2689_v7  ;;  %1541 = vmatpush1.msra.mxu1 %v2692_v61 }
 0x4f0   :  { %1471 = vmatprep.subr.mxu0 %v2772_v25  ;;  %1542 = vmatprep.subr.mxu1 %v2775_v26 }
 0x4f1   :  { %1472 = vmatpush1.msra.mxu0 %v2778_v28  ;;  %1543 = vmatpush1.msra.mxu1 %v2781_v29 }
 0x4f2   :  { %1473 = vmatprep.subr.mxu0 %v2784_v30  ;;  %1544 = vmatprep.subr.mxu1 %v2787_v31 }
 0x4f3   :  { %1474 = vmatpush1.msra.mxu0 %v2790_v33  ;;  %1545 = vmatpush1.msra.mxu1 %v2793_v8 }
 0x4f4   :  { %1475 = vmatprep.subr.mxu0 %v2796_v37  ;;  %1546 = vmatprep.subr.mxu1 %v2799_v38 }
 0x4f5   :  { %1476 = vmatpush1.msra.mxu0 %v2802_v39  ;;  %1547 = vmatpush1.msra.mxu1 %v2805_v40 }
 0x4f6   :  { %1477 = vmatprep.subr.mxu0 %v2808_v41  ;;  %1548 = vmatprep.subr.mxu1 %v2811_v42 }
 0x4f7   :  { %1478 = vmatpush1.msra.mxu0 %v2814_v43  ;;  %1549 = vmatpush1.msra.mxu1 %v2817_v44 }
 0x4f8   :  { %1479 = vmatprep.subr.mxu0 %v2820_v46  ;;  %1550 = vmatprep.subr.mxu1 %v2823_v47 }
 0x4f9   :  { %1480 = vmatpush1.msra.mxu0 %v2826_v48  ;;  %1551 = vmatpush1.msra.mxu1 %v2829_v49 }
 0x4fa   :  { %1481 = vmatprep.subr.mxu0 %v2832_v50  ;;  %1552 = vmatprep.subr.mxu1 %v3296_v34 }
 0x4fb   :  { %1482 = vmatpush1.msra.mxu0 %v3297_v35  ;;  %1553 = vmatpush1.msra.mxu1 %v3298_v15 }
 0x4fc   :  { %1483 = vmatprep.subr.mxu0 %v3299_v51  ;;  %1554 = vmatprep.subr.mxu1 %v3300_v52 }
 0x4fd   :  { %1484 = vmatpush1.msra.mxu0 %v3301_v53  ;;  %1555 = vmatpush1.msra.mxu1 %v3302_v55 }
 0x4fe   :  { %1485 = vmatprep.subr.mxu0 %v3303_v16  ;;  %1556 = vmatprep.subr.mxu1 %v3304_v17  ;;  %v3319_v16 = vld [vmem:[#allocation48_spill] sm:$0xff] }
 0x4ff   :  { %1486 = vmatpush1.msra.mxu0 %v3305_v22  ;;  %1557 = vmatpush1.msra.mxu1 %v3306_v20  ;;  %v3316_v20 = vld [vmem:[#allocation10_spill] sm:$0xff] }
 0x500   :  { %1487 = vmatprep.subr.mxu0 %v3307_v21  ;;  %1558 = vmatprep.subr.mxu1 %v3308_v19  ;;  %v3317_v21 = vld [vmem:[#allocation8_spill] sm:$0xff] }
 0x501   :  { %1488 = vmatpush1.msra.mxu0 %v3309_v12  ;;  %1559 = vmatpush1.msra.mxu1 %v3310_v57  ;;  %v3318_v12 = vld [vmem:[#allocation46_spill] sm:$0xff] }
 0x502   :  { %1489 = vmatprep.subr.mxu0 %v3311_v58  ;;  %1560 = vmatprep.subr.mxu1 %v3312_v54 }
 0x503   :  { %1490 = vmatpush1.msra.mxu0 %v3313_v32  ;;  %1523 = vmatprep.mubr.f32.mxu0 %v3314_v56  ;;  %v3320_v32 = vld [vmem:[#allocation47_spill] sm:$0xff] }
 0x504   :  { %1561 = vmatpush1.msra.mxu1 %v3315_v14  ;;  %1594 = vmatprep.mubr.f32.mxu1 %v3314_v56  ;;  %v3321_v56 = vld [vmem:[#allocation49_spill] sm:$0xff] }
 0x505   :  { %1631 = vmatprep.subr.mxu0 %v3316_v20  ;;  %1702 = vmatprep.subr.mxu1 %v3317_v21 }
 0x5a4   :  { %v1353_v19 = vpop.f32.mrf.mxu0  ;;  %v1424_v57 = vpop.f32.mrf.mxu1 }
 0x5a5   :  { %v1429_v22 = vadd.f32 %v1353_v19, %v3318_v12  ;;  %v1431_v55 = vadd.f32 %v1424_v57, %v3320_v32 }
 0x5a6   :  { %v1355_v17 = vpop.f32.mrf.mxu0  ;;  %v1426_v14 = vpop.f32.mrf.mxu1 }
 0x5a7   :  { %v1433_v58 = vmul.f32 0.5, %v1429_v22  ;;  %v1430_v54 = vadd.f32 %v1355_v17, %v3319_v16  ;;  %v1432_v52 = vadd.f32 %v1426_v14, %v3321_v56 }
 0x5a9   :  { %1882 = vtanh.f32 %v1433_v58  ;;  %v1437_v53 = vmul.f32 0.5, %v1430_v54  ;;  %v1442_v20 = vmul.f32 0.5, %v1432_v52 }
 0x5ab   :  { %1884 = vtanh.f32 %v1437_v53 }
 0x5ac   :  { %1886 = vtanh.f32 %v1431_v55 }
 0x5ad   :  { %1888 = vtanh.f32 %v1442_v20 }
 0x5b6   :  { %v1883_v51 = vpop.eup %1882 }
 0x5b7   :  { %v1435_v21 = vmul.f32 0.5, %v1883_v51 }
 0x5b8   :  { %v1885_v15 = vpop.eup %1884 }
 0x5b9   :  { %v1436_v35 = vadd.f32 0.5, %v1435_v21  ;;  %v1439_v19 = vmul.f32 0.5, %v1885_v15  ;;  %v1887_v12 = vpop.eup %1886  ;;  %v3346_v21 = vld [vmem:[#allocation54_spill] sm:$0xff] }
 0x5ba   :  { %v1889_v53 = vpop.eup %1888 }
 0x5bb   :  { %v1440_v22 = vadd.f32 0.5, %v1439_v19  ;;  %v1447_v34 = vmul.f32 %v1887_v12, %v1436_v35  ;;  %v1444_v55 = vmul.f32 0.5, %v1889_v53 }
 0x5bd   :  { %v1446_v16 = vmul.f32 %v1440_v22, %v2901_v13  ;;  %v1445_v57 = vadd.f32 0.5, %v1444_v55  ;;  %v3348_v55 = vld [vmem:[#allocation55_spill] sm:$0xff] }
 0x5bf   :  { %v2978_v17 = vadd.f32 %v1447_v34, %v1446_v16 }
 0x5c1   :  { %1890 = vtanh.f32 %v2978_v17 }
 0x5ce   :  { %v1891_v58 = vpop.eup %1890 }
 0x5cf   :  { %v1450_v52 = vmul.f32 %v1891_v58, %v1445_v57 }
 0x5d1   :  { %v1451_v54 = vmax.f32 %v1450_v52, 0.0  ;;  %1524 = vmatmul.mubr.f32.vlgmr.msra.gmra.mxu0 %v1450_v52  ;;  %1595 = vmatmul.mubr.f32.vlgmr.msra.gmra.mxu1 %v1450_v52 }
 0x5d2   :  { %1632 = vmatpush1.msra.mxu0 %v2626_v27  ;;  %1703 = vmatpush1.msra.mxu1 %v2629_v1  ;;  %v3322_v27 = vld [vmem:[#allocation32_spill] sm:$0xff]  ;;  %v3323_v1 = vld [vmem:[#allocation31_spill] sm:$0xff] }
 0x5d3   :  { %1825 = vst [vmem:[%s3067_s4 + $0x28] sm:$0xff] %v1451_v54  ;;  %1633 = vmatprep.subr.mxu0 %v2635_v63  ;;  %1704 = vmatprep.subr.mxu1 %v2638_v60  ;;  %v3324_v63 = vld [vmem:[#allocation33_spill] sm:$0xff]  ;;  %v3325_v60 = vld [vmem:[#allocation11_spill] sm:$0xff] }
 0x5d4   :  { %1634 = vmatpush1.msra.mxu0 %v2641_v5  ;;  %1705 = vmatpush1.msra.mxu1 %v2644_v2  ;;  %v3326_v5 = vld [vmem:[#allocation12_spill] sm:$0xff]  ;;  %v3327_v2 = vld [vmem:[#allocation13_spill] sm:$0xff] }
 0x5d5   :  { %1635 = vmatprep.subr.mxu0 %v2647_v9  ;;  %1706 = vmatprep.subr.mxu1 %v2650_v6  ;;  %v3328_v9 = vld [vmem:[#allocation14_spill] sm:$0xff]  ;;  %v3329_v6 = vld [vmem:[#allocation15_spill] sm:$0xff]  ;;  %v3349_v54 = vld [vmem:[#allocation57_spill] sm:$0xff] }
 0x5d6   :  { %1636 = vmatpush1.msra.mxu0 %v2653_v59  ;;  %1707 = vmatpush1.msra.mxu1 %v2656_v4  ;;  %v3330_v59 = vld [vmem:[#allocation16_spill] sm:$0xff]  ;;  %v3331_v4 = vld [vmem:[#allocation17_spill] sm:$0xff] }
 0x5d7   :  { %1637 = vmatprep.subr.mxu0 %v2659_v45  ;;  %1708 = vmatprep.subr.mxu1 %v2662_v0  ;;  %v3332_v45 = vld [vmem:[#allocation18_spill] sm:$0xff]  ;;  %v3333_v0 = vld [vmem:[#allocation19_spill] sm:$0xff] }
 0x5d8   :  { %1638 = vmatpush1.msra.mxu0 %v2665_v10  ;;  %1709 = vmatpush1.msra.mxu1 %v2668_v18  ;;  %v3334_v10 = vld [vmem:[#allocation20_spill] sm:$0xff]  ;;  %v3335_v18 = vld [vmem:[#allocation21_spill] sm:$0xff] }
 0x5d9   :  { %1639 = vmatprep.subr.mxu0 %v3271_v23  ;;  %1710 = vmatprep.subr.mxu1 %v3272_v24  ;;  %v3342_v24 = vld [vmem:[#allocation50_spill] sm:$0xff] }
 0x5da   :  { %1640 = vmatpush1.msra.mxu0 %v2677_v36  ;;  %1711 = vmatpush1.msra.mxu1 %v2680_v62  ;;  %v3338_v36 = vld [vmem:[#allocation24_spill] sm:$0xff]  ;;  %v3339_v62 = vld [vmem:[#allocation25_spill] sm:$0xff] }
 0x5db   :  { %1641 = vmatprep.subr.mxu0 %v2683_v11  ;;  %1712 = vmatprep.subr.mxu1 %v2686_v3  ;;  %v3340_v11 = vmov 0.0   ;;  %v3341_v3 = vld [vmem:[#allocation26_spill] sm:$0xff] }
 0x5dc   :  { %1642 = vmatpush1.msra.mxu0 %v2689_v7  ;;  %1713 = vmatpush1.msra.mxu1 %v2692_v61  ;;  %v3336_v7 = vld [vmem:[#allocation22_spill] sm:$0xff]  ;;  %v3337_v61 = vld [vmem:[#allocation23_spill] sm:$0xff] }
 0x5dd   :  { %1643 = vmatprep.subr.mxu0 %v2772_v25  ;;  %1714 = vmatprep.subr.mxu1 %v2775_v26 }
 0x5de   :  { %1644 = vmatpush1.msra.mxu0 %v2778_v28  ;;  %1715 = vmatpush1.msra.mxu1 %v2781_v29 }
 0x5df   :  { %1645 = vmatprep.subr.mxu0 %v2784_v30  ;;  %1716 = vmatprep.subr.mxu1 %v2787_v31  ;;  %v3343_v30 = vld [vmem:[#allocation52_spill] sm:$0xff] }
 0x5e0   :  { %1646 = vmatpush1.msra.mxu0 %v2790_v33  ;;  %1717 = vmatpush1.msra.mxu1 %v2793_v8  ;;  %v3344_v33 = vld [vmem:[#allocation51_spill] sm:$0xff] }
 0x5e1   :  { %1647 = vmatprep.subr.mxu0 %v2796_v37  ;;  %1718 = vmatprep.subr.mxu1 %v2799_v38 }
 0x5e2   :  { %1648 = vmatpush1.msra.mxu0 %v2802_v39  ;;  %1719 = vmatpush1.msra.mxu1 %v2805_v40  ;;  %v3345_v39 = vld [vmem:[#allocation53_spill] sm:$0xff] }
 0x5e3   :  { %1649 = vmatprep.subr.mxu0 %v2808_v41  ;;  %1720 = vmatprep.subr.mxu1 %v2811_v42 }
 0x5e4   :  { %1650 = vmatpush1.msra.mxu0 %v2814_v43  ;;  %1721 = vmatpush1.msra.mxu1 %v2817_v44 }
 0x5e5   :  { %1651 = vmatprep.subr.mxu0 %v2820_v46  ;;  %1722 = vmatprep.subr.mxu1 %v2823_v47 }
 0x5e6   :  { %1652 = vmatpush1.msra.mxu0 %v2826_v48  ;;  %1723 = vmatpush1.msra.mxu1 %v2829_v49 }
 0x5e7   :  { %1653 = vmatprep.subr.mxu0 %v2832_v50  ;;  %1724 = vmatprep.subr.mxu1 %v3322_v27 }
 0x5e8   :  { %1654 = vmatpush1.msra.mxu0 %v3323_v1  ;;  %1725 = vmatpush1.msra.mxu1 %v3324_v63 }
 0x5e9   :  { %1655 = vmatprep.subr.mxu0 %v3325_v60  ;;  %1726 = vmatprep.subr.mxu1 %v3326_v5 }
 0x5ea   :  { %1656 = vmatpush1.msra.mxu0 %v3327_v2  ;;  %1727 = vmatpush1.msra.mxu1 %v3328_v9 }
 0x5eb   :  { %1657 = vmatprep.subr.mxu0 %v3329_v6  ;;  %1728 = vmatprep.subr.mxu1 %v3330_v59 }
 0x5ec   :  { %1658 = vmatpush1.msra.mxu0 %v3331_v4  ;;  %1729 = vmatpush1.msra.mxu1 %v3332_v45 }
 0x5ed   :  { %1659 = vmatprep.subr.mxu0 %v3333_v0  ;;  %1730 = vmatprep.subr.mxu1 %v3334_v10 }
 0x5ee   :  { %1660 = vmatpush1.msra.mxu0 %v3335_v18  ;;  %1731 = vmatpush1.msra.mxu1 %v3336_v7 }
 0x5ef   :  { %1661 = vmatprep.subr.mxu0 %v3337_v61  ;;  %1732 = vmatprep.subr.mxu1 %v3338_v36 }
 0x5f0   :  { %1662 = vmatpush1.msra.mxu0 %v3339_v62  ;;  %1695 = vmatprep.mubr.f32.mxu0 %v3340_v11 }
 0x5f1   :  { %1733 = vmatpush1.msra.mxu1 %v3341_v3  ;;  %1766 = vmatprep.mubr.f32.mxu1 %v3340_v11 }
 0x691   :  { %v1525_v23 = vpop.f32.mrf.mxu0  ;;  %v1596_v26 = vpop.f32.mrf.mxu1 }
 0x692   :  { %v1601_v25 = vadd.f32 %v1525_v23, %v3342_v24  ;;  %v1603_v8 = vadd.f32 %v1596_v26, %v3344_v33 }
 0x693   :  { %v1527_v28 = vpop.f32.mrf.mxu0  ;;  %v1598_v38 = vpop.f32.mrf.mxu1 }
 0x694   :  { %v1605_v29 = vmul.f32 0.5, %v1601_v25  ;;  %v1602_v31 = vadd.f32 %v1527_v28, %v3343_v30  ;;  %v1604_v40 = vadd.f32 %v1598_v38, %v3345_v39 }
 0x696   :  { %1892 = vtanh.f32 %v1605_v29  ;;  %v1609_v37 = vmul.f32 0.5, %v1602_v31  ;;  %v1614_v41 = vmul.f32 0.5, %v1604_v40 }
 0x698   :  { %1894 = vtanh.f32 %v1609_v37 }
 0x699   :  { %1896 = vtanh.f32 %v1603_v8 }
 0x69a   :  { %1898 = vtanh.f32 %v1614_v41 }
 0x6a3   :  { %v1893_v42 = vpop.eup %1892 }
 0x6a4   :  { %v1607_v43 = vmul.f32 0.5, %v1893_v42 }
 0x6a5   :  { %v1895_v44 = vpop.eup %1894 }
 0x6a6   :  { %v1608_v46 = vadd.f32 0.5, %v1607_v43  ;;  %v1611_v47 = vmul.f32 0.5, %v1895_v44  ;;  %v1897_v48 = vpop.eup %1896 }
 0x6a7   :  { %v1899_v35 = vpop.eup %1898 }
 0x6a8   :  { %v1612_v49 = vadd.f32 0.5, %v1611_v47  ;;  %v1619_v50 = vmul.f32 %v1897_v48, %v1608_v46  ;;  %v1616_v15 = vmul.f32 0.5, %v1899_v35 }
 0x6aa   :  { %v1618_v13 = vmul.f32 %v1612_v49, %v2978_v17  ;;  %v1617_v51 = vadd.f32 0.5, %v1616_v15  ;;  %v3347_v17 = vld [vmem:[#allocation56_spill] sm:$0xff] }
 0x6ac   :  { %v1620_v34 = vadd.f32 %v1619_v50, %v1618_v13 }
 0x6ae   :  { %1900 = vtanh.f32 %v1620_v34 }
 0x6bb   :  { %v1901_v32 = vpop.eup %1900 }
 0x6bc   :  { %v1622_v56 = vmul.f32 %v1901_v32, %v1617_v51 }
 0x6be   :  { %v1623_v14 = vmax.f32 %v1622_v56, 0.0  ;;  %1696 = vmatmul.mubr.f32.vlgmr.msra.gmra.mxu0 %v1622_v56  ;;  %1767 = vmatmul.mubr.f32.vlgmr.msra.gmra.mxu1 %v1622_v56 }
 0x6c0   :  { %1826 = vst [vmem:[%s3067_s4 + $0x30] sm:$0xff] %v1623_v14 }
 0x77e   :  { %v1697_v20 = vpop.f32.mrf.mxu0  ;;  %v1768_v12 = vpop.f32.mrf.mxu1 }
 0x77f   :  { %v1773_v19 = vadd.f32 %v1697_v20, %v3346_v21  ;;  %v1775_v57 = vadd.f32 %v1768_v12, %v3348_v55 }
 0x780   :  { %v1699_v22 = vpop.f32.mrf.mxu0  ;;  %v1770_v52 = vpop.f32.mrf.mxu1 }
 0x781   :  { %v1777_v16 = vmul.f32 0.5, %v1773_v19  ;;  %v1774_v53 = vadd.f32 %v1699_v22, %v3347_v17  ;;  %v1776_v27 = vadd.f32 %v1770_v52, %v3349_v54 }
 0x783   :  { %1902 = vtanh.f32 %v1777_v16  ;;  %v1781_v58 = vmul.f32 0.5, %v1774_v53  ;;  %v1786_v1 = vmul.f32 0.5, %v1776_v27 }
 0x785   :  { %1904 = vtanh.f32 %v1781_v58 }
 0x786   :  { %1906 = vtanh.f32 %v1775_v57 }
 0x787   :  { %1908 = vtanh.f32 %v1786_v1 }
 0x790   :  { %v1903_v63 = vpop.eup %1902 }
 0x791   :  { %v1779_v60 = vmul.f32 0.5, %v1903_v63 }
 0x792   :  { %v1905_v5 = vpop.eup %1904 }
 0x793   :  { %v1780_v2 = vadd.f32 0.5, %v1779_v60  ;;  %v1783_v9 = vmul.f32 0.5, %v1905_v5  ;;  %v1907_v6 = vpop.eup %1906 }
 0x794   :  { %v1909_v10 = vpop.eup %1908 }
 0x795   :  { %v1784_v59 = vadd.f32 0.5, %v1783_v9  ;;  %v1791_v4 = vmul.f32 %v1907_v6, %v1780_v2  ;;  %v1788_v18 = vmul.f32 0.5, %v1909_v10 }
 0x797   :  { %v1790_v45 = vmul.f32 %v1784_v59, %v1620_v34  ;;  %v1789_v7 = vadd.f32 0.5, %v1788_v18 }
 0x799   :  { %v1792_v0 = vadd.f32 %v1791_v4, %v1790_v45 }
 0x79b   :  { %1910 = vtanh.f32 %v1792_v0 }
 0x7a8   :  { %v1911_v61 = vpop.eup %1910 }
 0x7a9   :  { %v1794_v36 = vmul.f32 %v1911_v61, %v1789_v7 }
 0x7ab   :  { %v1795_v62 = vmax.f32 %v1794_v36, 0.0 }
 0x7ad   :  { %1827 = vst [vmem:[%s3067_s4 + $0x38] sm:$0xff] %v1795_v62 }
 0x7ae   :  { %1804 = vsyncpa [#allocation6], 1 }

</bundles_post_ra>
